<compile_context>
chip_gen: v7x
topology: tpu7x:2x2x1
jax: 0.10.0
libtpu: 0.0.40
codegen_flags: <defaults>
</compile_context>

<pallas_src>
import math
from types import SimpleNamespace

import jax
import jax.numpy as jnp
from jax.experimental import pallas as pl
from jax.experimental.pallas import tpu as pltpu


sender_genotype = SimpleNamespace(
    recurrent=[
        ("sigmoid", 0),
        ("relu", 1),
        ("relu", 1),
        ("identity", 1),
        ("tanh", 2),
        ("sigmoid", 5),
        ("tanh", 3),
        ("relu", 5),
    ],
    concat=list(range(1, 9)),
)

_ACTS = {
    "tanh": jnp.tanh,
    "relu": lambda v: jnp.maximum(v, 0.0),
    "sigmoid": jax.nn.sigmoid,
    "identity": lambda v: v,
}


def _group_steps(recurrent):
    """Group genotype steps by predecessor state.

    Processing groups in increasing-predecessor order is always legal for a
    DARTS genotype: state p (p >= 1) is produced by step p-1, whose own
    predecessor is < p, so it belongs to an earlier group.
    """
    by_pred = {}
    for j, (_, pred) in enumerate(recurrent):
        by_pred.setdefault(pred, []).append(j)
    return [(pred, tuple(by_pred[pred])) for pred in sorted(by_pred)]


def _make_kernel(nhid, genotype, groups, group_offsets, n_buf, depth):
    recurrent = genotype.recurrent
    concat = frozenset(genotype.concat)
    preds_needed = frozenset(p for _, p in recurrent)
    inv_n = 1.0 / float(len(genotype.concat))
    two_h = 2 * nhid
    n_groups = len(groups)

    def kernel(x_ref, h_ref, w0x_ref, w0h_ref, ws_hbm, out_ref, wbuf, sem):
        # One DMA descriptor per fused weight group (bf16, HBM -> VMEM),
        # multi-buffered over n_buf VMEM slots / n_buf DMA semaphores.
        copies = []
        for g, (_, js) in enumerate(groups):
            gw = len(js) * two_h
            off = group_offsets[g]
            copies.append(
                pltpu.make_async_copy(
                    ws_hbm.at[:, off:off + gw],
                    wbuf.at[g % n_buf, :, :gw],
                    sem.at[g % n_buf],
                )
            )
        # Prefetch the first `depth` groups so their DMAs overlap the init
        # matmul / early group compute.
        for g in range(min(depth, n_groups)):
            copies[g].start()

        x16 = x_ref[...].astype(jnp.bfloat16)
        h_prev = h_ref[...]                      # f32
        h16 = h_prev.astype(jnp.bfloat16)

        # init state: [x, h_prev] @ W0 == x @ W0[:ninp] + h_prev @ W0[ninp:]
        ch0 = (
            jnp.dot(x16, w0x_ref[...], preferred_element_type=jnp.float32)
            + jnp.dot(h16, w0h_ref[...], preferred_element_type=jnp.float32)
        )
        c0 = jax.nn.sigmoid(ch0[:, :nhid])
        h0 = jnp.tanh(ch0[:, nhid:])
        s0 = h_prev + c0 * (h0 - h_prev)

        states = {0: s0}
        acc = s0 if 0 in concat else None

        for g, (pred, js) in enumerate(groups):
            copies[g].wait()
            if g + depth < n_groups:
                # Prefetch a later group's weights.  Its slot was last read by
                # group g - n_buf + depth (already computed), so the
                # write-after-read hazard is resolved by program order.
                copies[g + depth].start()
            gw = len(js) * two_h
            s_pred = states.pop(pred)      # last use of this predecessor state
            # One wide fused matmul for every step sharing this predecessor.
            ch_wide = jnp.dot(
                s_pred.astype(jnp.bfloat16),
                wbuf[g % n_buf, :, :gw],
                preferred_element_type=jnp.float32,
            )
            for pos, j in enumerate(js):
                name = recurrent[j][0]
                base = pos * two_h
                c = jax.nn.sigmoid(ch_wide[:, base:base + nhid])
                hc = _ACTS[name](ch_wide[:, base + nhid:base + two_h])
                s_new = s_pred + c * (hc - s_pred)
                sidx = j + 1
                if sidx in concat:
                    acc = s_new if acc is None else acc + s_new
                if sidx in preds_needed:
                    states[sidx] = s_new     # keep live only if needed later

        out_ref[...] = (acc * inv_n).astype(out_ref.dtype)

    return kernel


def dg_sender_cell_forward(x, h_prev, w0, ws, genotype=sender_genotype, *,
                           batch_tile=None):
    """Forward pass of DGSenderCell.

    x:      [B, ninp]             float32
    h_prev: [B, nhid]             float32
    w0:     [ninp + nhid, 2*nhid] float32
    ws:     [steps, nhid, 2*nhid] float32
    """
    B, ninp = x.shape
    nhid = h_prev.shape[1]
    steps = ws.shape[0]
    assert steps == len(genotype.recurrent)
    two_h = 2 * nhid

    if batch_tile is None:
        batch_tile = B if B <= 256 else 256
    assert B % batch_tile == 0, "batch must be divisible by the batch tile"
    grid = (B // batch_tile,)

    # bf16 weights: half the DMA bytes, bf16-native MXU path.
    w0x = w0[:ninp].astype(jnp.bfloat16)      # [ninp, 2*nhid]
    w0h = w0[ninp:].astype(jnp.bfloat16)      # [nhid, 2*nhid]

    groups = _group_steps(genotype.recurrent)
    order = [j for _, js in groups for j in js]
    group_offsets, off = [], 0
    for _, js in groups:
        group_offsets.append(off)
        off += len(js) * two_h
    max_gw = max(len(js) for _, js in groups) * two_h

    # Per-step weights reordered by group and concatenated along N so every
    # fused group is one contiguous lane slice: [nhid, steps * 2*nhid] bf16.
    ws_flat = jnp.concatenate([ws[j] for j in order], axis=1).astype(jnp.bfloat16)

    # Choose prefetch depth: 3 buffers (depth 2) when they fit in a modest
    # VMEM budget, else classic double buffering (depth 1).
    buf_bytes = nhid * max_gw * 2                      # one bf16 weight buffer
    desired_depth = 2 if 3 * buf_bytes <= 12 * 1024 * 1024 else 1
    depth = max(1, min(desired_depth, len(groups)))
    n_buf = depth + 1

    kernel = _make_kernel(nhid, genotype, groups, tuple(group_offsets),
                          n_buf, depth)

    flops = 2 * B * (ninp + nhid) * two_h + 2 * B * nhid * two_h * steps
    transcendentals = B * two_h * (steps + 1)
    bytes_accessed = (x.size * 4 + h_prev.size * 4 + B * nhid * 4
                      + w0x.size * 2 + w0h.size * 2
                      + (B // batch_tile) * ws_flat.size * 2)

    return pl.pallas_call(
        kernel,
        out_shape=jax.ShapeDtypeStruct((B, nhid), jnp.float32),
        grid_spec=pltpu.PrefetchScalarGridSpec(
            num_scalar_prefetch=0,
            grid=grid,
            in_specs=[
                pl.BlockSpec((batch_tile, ninp), lambda i: (i, 0)),
                pl.BlockSpec((batch_tile, nhid), lambda i: (i, 0)),
                # Init weights: constant block index -> VMEM-resident across
                # batch tiles (single DMA).
                pl.BlockSpec((ninp, two_h), lambda i: (0, 0)),
                pl.BlockSpec((nhid, two_h), lambda i: (0, 0)),
                # Step weights stay in HBM; manually multi-buffered per group.
                pl.BlockSpec(memory_space=pl.ANY),
            ],
            out_specs=pl.BlockSpec((batch_tile, nhid), lambda i: (i, 0)),
            scratch_shapes=[
                pltpu.VMEM((n_buf, nhid, max_gw), jnp.bfloat16),
                pltpu.SemaphoreType.DMA((n_buf,)),
            ],
        ),
        compiler_params=pltpu.CompilerParams(
            dimension_semantics=("parallel",),
            vmem_limit_bytes=32 * 1024 * 1024,
        ),
        cost_estimate=pl.CostEstimate(
            flops=int(flops),
            transcendentals=int(transcendentals),
            bytes_accessed=int(bytes_accessed),
        ),
    )(x, h_prev, w0x, w0h, ws_flat)


# ----------------------------------------------------------------------------
# Deterministic parameter init (Xavier uniform, matching nn.init.xavier_uniform_)
# ----------------------------------------------------------------------------
def _xavier_uniform(key, shape):
    fan_in, fan_out = shape[-2], shape[-1]
    limit = math.sqrt(6.0 / (fan_in + fan_out))
    return jax.random.uniform(key, shape, jnp.float32, -limit, limit)


def _reference_forward(x, h_prev, w0, ws, genotype):
    """Plain-JAX reference mirroring the PyTorch module, using the same bf16
    weight/LHS quantization the kernel uses (f32 accumulation)."""
    nhid = h_prev.shape[1]
    ninp = x.shape[1]
    w0x = w0[:ninp].astype(jnp.bfloat16)
    w0h = w0[ninp:].astype(jnp.bfloat16)
    ws16 = ws.astype(jnp.bfloat16)
    ch0 = (
        jnp.dot(x.astype(jnp.bfloat16), w0x, preferred_element_type=jnp.float32)
        + jnp.dot(h_prev.astype(jnp.bfloat16), w0h, preferred_element_type=jnp.float32)
    )
    c0 = jax.nn.sigmoid(ch0[:, :nhid])
    h0 = jnp.tanh(ch0[:, nhid:])
    s0 = h_prev + c0 * (h0 - h_prev)
    states = [s0]
    for i, (name, pred) in enumerate(genotype.recurrent):
        s_prev = states[pred]
        ch = jnp.dot(s_prev.astype(jnp.bfloat16), ws16[i],
                     preferred_element_type=jnp.float32)
        c = jax.nn.sigmoid(ch[:, :nhid])
        h = _ACTS[name](ch[:, nhid:])
        states.append(s_prev + c * (h - s_prev))
    return jnp.mean(jnp.stack([states[i] for i in genotype.concat], -1), -1)


if __name__ == "__main__":
    B, ninp, nhid = 8, 64, 128
    steps = len(sender_genotype.recurrent)

    key = jax.random.PRNGKey(0)
    kx, kh, kw0, kws = jax.random.split(key, 4)

    x = jax.random.normal(kx, (B, ninp), jnp.float32)
    h_prev = jax.random.normal(kh, (B, nhid), jnp.float32)
    w0 = _xavier_uniform(kw0, (ninp + nhid, 2 * nhid))
    ws = jnp.stack(
        [_xavier_uniform(k, (nhid, 2 * nhid)) for k in jax.random.split(kws, steps)],
        axis=0,
    )

    out = dg_sender_cell_forward(x, h_prev, w0, ws)
    out = jax.block_until_ready(out)

    ref = _reference_forward(x, h_prev, w0, ws, sender_genotype)
    assert out.shape == (B, nhid)
    # Tolerance reflects the bf16 weight/LHS quantization (reference uses the
    # same quantization, so the residual difference is only transcendental /
    # accumulation-order noise).
    max_err = float(jnp.max(jnp.abs(out - ref)))
    assert jnp.allclose(out, ref, atol=5e-3, rtol=5e-3), (
        f"mismatch vs reference (max abs err {max_err})"
    )

    print("KERNEL_OK")
</pallas_src>

<mosaic_0001>
module attributes {stable_mosaic.version = 11 : i64} {
  func.func @kernel(%arg0: i32, %arg1: memref<8x64xf32, #tpu.memory_space<vmem>>, %arg2: memref<8x128xf32, #tpu.memory_space<vmem>>, %arg3: memref<64x256xbf16, #tpu.memory_space<vmem>>, %arg4: memref<128x256xbf16, #tpu.memory_space<vmem>>, %arg5: memref<128x2048xbf16, #tpu.memory_space<any>>, %arg6: memref<8x128xf32, #tpu.memory_space<vmem>>, %arg7: memref<3x128x768xbf16, #tpu.memory_space<vmem>>, %arg8: memref<3x!tpu.dma_semaphore, #tpu.memory_space<semaphore_mem>>) attributes {dimension_semantics = [#tpu.dimension_semantics<parallel>], iteration_bounds = array<i64: 1>, scalar_prefetch = 0 : i64, scratch_operands = 2 : i64, tpu.core_type = #tpu.core_type<tc>, window_params = [{transform_indices = @transform_0, window_bounds = array<i64: 8, 64>}, {transform_indices = @transform_1, window_bounds = array<i64: 8, 128>}, {pipeline_mode = #tpu.pipeline_mode<synchronous>, transform_indices = @transform_2, window_bounds = array<i64: 64, 256>}, {pipeline_mode = #tpu.pipeline_mode<synchronous>, transform_indices = @transform_3, window_bounds = array<i64: 128, 256>}, {}, {transform_indices = @transform_5, window_bounds = array<i64: 8, 128>}]} {
    %c0_i32 = arith.constant 0 : i32
    %c0_i32_0 = arith.constant 0 : i32
    %c0_i32_1 = arith.constant 0 : i32
    %c0_i32_2 = arith.constant 0 : i32
    %0 = tpu.memref_slice %arg5[%c0_i32_1, %c0_i32_2] : memref<128x2048xbf16, #tpu.memory_space<any>> -> memref<128x256xbf16, #tpu.memory_space<any>>
    %c0_i32_3 = arith.constant 0 : i32
    %c0_i32_4 = arith.constant 0 : i32
    %1 = tpu.memref_slice %arg7[%c0_i32, %c0_i32_3, %c0_i32_4] : memref<3x128x768xbf16, #tpu.memory_space<vmem>> -> memref<1x128x256xbf16, #tpu.memory_space<vmem>>
    %2 = tpu.memref_squeeze %1 : memref<1x128x256xbf16, #tpu.memory_space<vmem>> -> memref<128x256xbf16, #tpu.memory_space<vmem>>
    %3 = tpu.memref_slice %arg8[%c0_i32_0] : memref<3x!tpu.dma_semaphore, #tpu.memory_space<semaphore_mem>> -> memref<1x!tpu.dma_semaphore, #tpu.memory_space<semaphore_mem>>
    %4 = tpu.memref_squeeze %3 : memref<1x!tpu.dma_semaphore, #tpu.memory_space<semaphore_mem>> -> memref<!tpu.dma_semaphore, #tpu.memory_space<semaphore_mem>>
    tpu.enqueue_dma source(%0 : memref<128x256xbf16, #tpu.memory_space<any>>) target(%2 : memref<128x256xbf16, #tpu.memory_space<vmem>>) target_semaphore(%4 : memref<!tpu.dma_semaphore, #tpu.memory_space<semaphore_mem>>)
    %c1_i32 = arith.constant 1 : i32
    %c1_i32_5 = arith.constant 1 : i32
    %c0_i32_6 = arith.constant 0 : i32
    %c256_i32 = arith.constant 256 : i32
    %5 = tpu.memref_slice %arg5[%c0_i32_6, %c256_i32] : memref<128x2048xbf16, #tpu.memory_space<any>> -> memref<128x768xbf16, #tpu.memory_space<any>>
    %c0_i32_7 = arith.constant 0 : i32
    %c0_i32_8 = arith.constant 0 : i32
    %6 = tpu.memref_slice %arg7[%c1_i32, %c0_i32_7, %c0_i32_8] : memref<3x128x768xbf16, #tpu.memory_space<vmem>> -> memref<1x128x768xbf16, #tpu.memory_space<vmem>>
    %7 = tpu.memref_squeeze %6 : memref<1x128x768xbf16, #tpu.memory_space<vmem>> -> memref<128x768xbf16, #tpu.memory_space<vmem>>
    %8 = tpu.memref_slice %arg8[%c1_i32_5] : memref<3x!tpu.dma_semaphore, #tpu.memory_space<semaphore_mem>> -> memref<1x!tpu.dma_semaphore, #tpu.memory_space<semaphore_mem>>
    %9 = tpu.memref_squeeze %8 : memref<1x!tpu.dma_semaphore, #tpu.memory_space<semaphore_mem>> -> memref<!tpu.dma_semaphore, #tpu.memory_space<semaphore_mem>>
    tpu.enqueue_dma source(%5 : memref<128x768xbf16, #tpu.memory_space<any>>) target(%7 : memref<128x768xbf16, #tpu.memory_space<vmem>>) target_semaphore(%9 : memref<!tpu.dma_semaphore, #tpu.memory_space<semaphore_mem>>)
    %c0 = arith.constant 0 : index
    %c0_9 = arith.constant 0 : index
    %10 = vector.load %arg1[%c0, %c0_9] : memref<8x64xf32, #tpu.memory_space<vmem>>, vector<8x64xf32>
    %11 = arith.truncf %10 : vector<8x64xf32> to vector<8x64xbf16>
    %c0_10 = arith.constant 0 : index
    %c0_11 = arith.constant 0 : index
    %12 = vector.load %arg2[%c0_10, %c0_11] : memref<8x128xf32, #tpu.memory_space<vmem>>, vector<8x128xf32>
    %13 = arith.truncf %12 : vector<8x128xf32> to vector<8x128xbf16>
    %c0_12 = arith.constant 0 : index
    %c0_13 = arith.constant 0 : index
    %14 = vector.load %arg3[%c0_12, %c0_13] : memref<64x256xbf16, #tpu.memory_space<vmem>>, vector<64x256xbf16>
    %cst = arith.constant dense<0.000000e+00> : vector<8x256xf32>
    %15 = tpu.matmul %11, %14, %cst {dimension_numbers = #tpu.dot_dimension_numbers<[1], [0], [0], [1], [0, 0, 1, 1], [], []>} : vector<8x64xbf16>, vector<64x256xbf16>, vector<8x256xf32> -> vector<8x256xf32>
    %c0_14 = arith.constant 0 : index
    %c0_15 = arith.constant 0 : index
    %16 = vector.load %arg4[%c0_14, %c0_15] : memref<128x256xbf16, #tpu.memory_space<vmem>>, vector<128x256xbf16>
    %cst_16 = arith.constant dense<0.000000e+00> : vector<8x256xf32>
    %17 = tpu.matmul %13, %16, %cst_16 {dimension_numbers = #tpu.dot_dimension_numbers<[1], [0], [0], [1], [0, 0, 1, 1], [], []>} : vector<8x128xbf16>, vector<128x256xbf16>, vector<8x256xf32> -> vector<8x256xf32>
    %18 = arith.addf %15, %17 : vector<8x256xf32>
    %19 = vector.extract_strided_slice %18 {offsets = [0, 0], sizes = [8, 128], strides = [1, 1]} : vector<8x256xf32> to vector<8x128xf32>
    %20 = arith.negf %19 : vector<8x128xf32>
    %21 = math.exp %20 : vector<8x128xf32>
    %cst_17 = arith.constant 1.000000e+00 : f32
    %22 = vector.broadcast %cst_17 : f32 to vector<8x128xf32>
    %23 = arith.addf %22, %21 : vector<8x128xf32>
    %24 = arith.divf %22, %23 : vector<8x128xf32>
    %25 = vector.extract_strided_slice %18 {offsets = [0, 128], sizes = [8, 128], strides = [1, 1]} : vector<8x256xf32> to vector<8x128xf32>
    %26 = math.tanh %25 : vector<8x128xf32>
    %27 = arith.subf %26, %12 : vector<8x128xf32>
    %28 = arith.mulf %24, %27 : vector<8x128xf32>
    %29 = arith.addf %12, %28 : vector<8x128xf32>
    %c0_i32_18 = arith.constant 0 : i32
    %c0_i32_19 = arith.constant 0 : i32
    %c0_i32_20 = arith.constant 0 : i32
    %c0_i32_21 = arith.constant 0 : i32
    %30 = tpu.memref_slice %arg5[%c0_i32_20, %c0_i32_21] : memref<128x2048xbf16, #tpu.memory_space<any>> -> memref<128x256xbf16, #tpu.memory_space<any>>
    %c0_i32_22 = arith.constant 0 : i32
    %c0_i32_23 = arith.constant 0 : i32
    %31 = tpu.memref_slice %arg7[%c0_i32_18, %c0_i32_22, %c0_i32_23] : memref<3x128x768xbf16, #tpu.memory_space<vmem>> -> memref<1x128x256xbf16, #tpu.memory_space<vmem>>
    %32 = tpu.memref_squeeze %31 : memref<1x128x256xbf16, #tpu.memory_space<vmem>> -> memref<128x256xbf16, #tpu.memory_space<vmem>>
    %33 = tpu.memref_slice %arg8[%c0_i32_19] : memref<3x!tpu.dma_semaphore, #tpu.memory_space<semaphore_mem>> -> memref<1x!tpu.dma_semaphore, #tpu.memory_space<semaphore_mem>>
    %34 = tpu.memref_squeeze %33 : memref<1x!tpu.dma_semaphore, #tpu.memory_space<semaphore_mem>> -> memref<!tpu.dma_semaphore, #tpu.memory_space<semaphore_mem>>
    tpu.wait_dma2 semaphore(%34 : memref<!tpu.dma_semaphore, #tpu.memory_space<semaphore_mem>>) src(%30 : memref<128x256xbf16, #tpu.memory_space<any>>) dst(%32 : memref<128x256xbf16, #tpu.memory_space<vmem>>)
    %c2_i32 = arith.constant 2 : i32
    %c2_i32_24 = arith.constant 2 : i32
    %c0_i32_25 = arith.constant 0 : i32
    %c1024_i32 = arith.constant 1024 : i32
    %35 = tpu.memref_slice %arg5[%c0_i32_25, %c1024_i32] : memref<128x2048xbf16, #tpu.memory_space<any>> -> memref<128x256xbf16, #tpu.memory_space<any>>
    %c0_i32_26 = arith.constant 0 : i32
    %c0_i32_27 = arith.constant 0 : i32
    %36 = tpu.memref_slice %arg7[%c2_i32, %c0_i32_26, %c0_i32_27] : memref<3x128x768xbf16, #tpu.memory_space<vmem>> -> memref<1x128x256xbf16, #tpu.memory_space<vmem>>
    %37 = tpu.memref_squeeze %36 : memref<1x128x256xbf16, #tpu.memory_space<vmem>> -> memref<128x256xbf16, #tpu.memory_space<vmem>>
    %38 = tpu.memref_slice %arg8[%c2_i32_24] : memref<3x!tpu.dma_semaphore, #tpu.memory_space<semaphore_mem>> -> memref<1x!tpu.dma_semaphore, #tpu.memory_space<semaphore_mem>>
    %39 = tpu.memref_squeeze %38 : memref<1x!tpu.dma_semaphore, #tpu.memory_space<semaphore_mem>> -> memref<!tpu.dma_semaphore, #tpu.memory_space<semaphore_mem>>
    tpu.enqueue_dma source(%35 : memref<128x256xbf16, #tpu.memory_space<any>>) target(%37 : memref<128x256xbf16, #tpu.memory_space<vmem>>) target_semaphore(%39 : memref<!tpu.dma_semaphore, #tpu.memory_space<semaphore_mem>>)
    %40 = arith.truncf %29 : vector<8x128xf32> to vector<8x128xbf16>
    %c0_28 = arith.constant 0 : index
    %c0_29 = arith.constant 0 : index
    %c0_30 = arith.constant 0 : index
    %41 = vector.load %arg7[%c0_28, %c0_29, %c0_30] : memref<3x128x768xbf16, #tpu.memory_space<vmem>>, vector<1x128x256xbf16>
    %42 = vector.shape_cast %41 : vector<1x128x256xbf16> to vector<128x256xbf16>
    %cst_31 = arith.constant dense<0.000000e+00> : vector<8x256xf32>
    %43 = tpu.matmul %40, %42, %cst_31 {dimension_numbers = #tpu.dot_dimension_numbers<[1], [0], [0], [1], [0, 0, 1, 1], [], []>} : vector<8x128xbf16>, vector<128x256xbf16>, vector<8x256xf32> -> vector<8x256xf32>
    %44 = vector.extract_strided_slice %43 {offsets = [0, 0], sizes = [8, 128], strides = [1, 1]} : vector<8x256xf32> to vector<8x128xf32>
    %45 = arith.negf %44 : vector<8x128xf32>
    %46 = math.exp %45 : vector<8x128xf32>
    %cst_32 = arith.constant 1.000000e+00 : f32
    %47 = vector.broadcast %cst_32 : f32 to vector<8x128xf32>
    %48 = arith.addf %47, %46 : vector<8x128xf32>
    %49 = arith.divf %47, %48 : vector<8x128xf32>
    %50 = vector.extract_strided_slice %43 {offsets = [0, 128], sizes = [8, 128], strides = [1, 1]} : vector<8x256xf32> to vector<8x128xf32>
    %51 = arith.negf %50 : vector<8x128xf32>
    %52 = math.exp %51 : vector<8x128xf32>
    %cst_33 = arith.constant 1.000000e+00 : f32
    %53 = vector.broadcast %cst_33 : f32 to vector<8x128xf32>
    %54 = arith.addf %53, %52 : vector<8x128xf32>
    %55 = arith.divf %53, %54 : vector<8x128xf32>
    %56 = arith.subf %55, %29 : vector<8x128xf32>
    %57 = arith.mulf %49, %56 : vector<8x128xf32>
    %58 = arith.addf %29, %57 : vector<8x128xf32>
    %c1_i32_34 = arith.constant 1 : i32
    %c1_i32_35 = arith.constant 1 : i32
    %c0_i32_36 = arith.constant 0 : i32
    %c256_i32_37 = arith.constant 256 : i32
    %59 = tpu.memref_slice %arg5[%c0_i32_36, %c256_i32_37] : memref<128x2048xbf16, #tpu.memory_space<any>> -> memref<128x768xbf16, #tpu.memory_space<any>>
    %c0_i32_38 = arith.constant 0 : i32
    %c0_i32_39 = arith.constant 0 : i32
    %60 = tpu.memref_slice %arg7[%c1_i32_34, %c0_i32_38, %c0_i32_39] : memref<3x128x768xbf16, #tpu.memory_space<vmem>> -> memref<1x128x768xbf16, #tpu.memory_space<vmem>>
    %61 = tpu.memref_squeeze %60 : memref<1x128x768xbf16, #tpu.memory_space<vmem>> -> memref<128x768xbf16, #tpu.memory_space<vmem>>
    %62 = tpu.memref_slice %arg8[%c1_i32_35] : memref<3x!tpu.dma_semaphore, #tpu.memory_space<semaphore_mem>> -> memref<1x!tpu.dma_semaphore, #tpu.memory_space<semaphore_mem>>
    %63 = tpu.memref_squeeze %62 : memref<1x!tpu.dma_semaphore, #tpu.memory_space<semaphore_mem>> -> memref<!tpu.dma_semaphore, #tpu.memory_space<semaphore_mem>>
    tpu.wait_dma2 semaphore(%63 : memref<!tpu.dma_semaphore, #tpu.memory_space<semaphore_mem>>) src(%59 : memref<128x768xbf16, #tpu.memory_space<any>>) dst(%61 : memref<128x768xbf16, #tpu.memory_space<vmem>>)
    %c0_i32_40 = arith.constant 0 : i32
    %c0_i32_41 = arith.constant 0 : i32
    %c0_i32_42 = arith.constant 0 : i32
    %c1280_i32 = arith.constant 1280 : i32
    %64 = tpu.memref_slice %arg5[%c0_i32_42, %c1280_i32] : memref<128x2048xbf16, #tpu.memory_space<any>> -> memref<128x256xbf16, #tpu.memory_space<any>>
    %c0_i32_43 = arith.constant 0 : i32
    %c0_i32_44 = arith.constant 0 : i32
    %65 = tpu.memref_slice %arg7[%c0_i32_40, %c0_i32_43, %c0_i32_44] : memref<3x128x768xbf16, #tpu.memory_space<vmem>> -> memref<1x128x256xbf16, #tpu.memory_space<vmem>>
    %66 = tpu.memref_squeeze %65 : memref<1x128x256xbf16, #tpu.memory_space<vmem>> -> memref<128x256xbf16, #tpu.memory_space<vmem>>
    %67 = tpu.memref_slice %arg8[%c0_i32_41] : memref<3x!tpu.dma_semaphore, #tpu.memory_space<semaphore_mem>> -> memref<1x!tpu.dma_semaphore, #tpu.memory_space<semaphore_mem>>
    %68 = tpu.memref_squeeze %67 : memref<1x!tpu.dma_semaphore, #tpu.memory_space<semaphore_mem>> -> memref<!tpu.dma_semaphore, #tpu.memory_space<semaphore_mem>>
    tpu.enqueue_dma source(%64 : memref<128x256xbf16, #tpu.memory_space<any>>) target(%66 : memref<128x256xbf16, #tpu.memory_space<vmem>>) target_semaphore(%68 : memref<!tpu.dma_semaphore, #tpu.memory_space<semaphore_mem>>)
    %69 = arith.truncf %58 : vector<8x128xf32> to vector<8x128xbf16>
    %c1 = arith.constant 1 : index
    %c0_45 = arith.constant 0 : index
    %c0_46 = arith.constant 0 : index
    %70 = vector.load %arg7[%c1, %c0_45, %c0_46] : memref<3x128x768xbf16, #tpu.memory_space<vmem>>, vector<1x128x768xbf16>
    %71 = vector.shape_cast %70 : vector<1x128x768xbf16> to vector<128x768xbf16>
    %cst_47 = arith.constant dense<0.000000e+00> : vector<8x768xf32>
    %72 = tpu.matmul %69, %71, %cst_47 {dimension_numbers = #tpu.dot_dimension_numbers<[1], [0], [0], [1], [0, 0, 1, 1], [], []>} : vector<8x128xbf16>, vector<128x768xbf16>, vector<8x768xf32> -> vector<8x768xf32>
    %73 = vector.extract_strided_slice %72 {offsets = [0, 0], sizes = [8, 128], strides = [1, 1]} : vector<8x768xf32> to vector<8x128xf32>
    %74 = arith.negf %73 : vector<8x128xf32>
    %75 = math.exp %74 : vector<8x128xf32>
    %cst_48 = arith.constant 1.000000e+00 : f32
    %76 = vector.broadcast %cst_48 : f32 to vector<8x128xf32>
    %77 = arith.addf %76, %75 : vector<8x128xf32>
    %78 = arith.divf %76, %77 : vector<8x128xf32>
    %79 = vector.extract_strided_slice %72 {offsets = [0, 128], sizes = [8, 128], strides = [1, 1]} : vector<8x768xf32> to vector<8x128xf32>
    %cst_49 = arith.constant 0.000000e+00 : f32
    %80 = vector.broadcast %cst_49 : f32 to vector<8x128xf32>
    %81 = arith.maximumf %79, %80 : vector<8x128xf32>
    %82 = arith.subf %81, %58 : vector<8x128xf32>
    %83 = arith.mulf %78, %82 : vector<8x128xf32>
    %84 = arith.addf %58, %83 : vector<8x128xf32>
    %85 = arith.addf %58, %84 : vector<8x128xf32>
    %86 = vector.extract_strided_slice %72 {offsets = [0, 256], sizes = [8, 128], strides = [1, 1]} : vector<8x768xf32> to vector<8x128xf32>
    %87 = arith.negf %86 : vector<8x128xf32>
    %88 = math.exp %87 : vector<8x128xf32>
    %cst_50 = arith.constant 1.000000e+00 : f32
    %89 = vector.broadcast %cst_50 : f32 to vector<8x128xf32>
    %90 = arith.addf %89, %88 : vector<8x128xf32>
    %91 = arith.divf %89, %90 : vector<8x128xf32>
    %92 = vector.extract_strided_slice %72 {offsets = [0, 384], sizes = [8, 128], strides = [1, 1]} : vector<8x768xf32> to vector<8x128xf32>
    %cst_51 = arith.constant 0.000000e+00 : f32
    %93 = vector.broadcast %cst_51 : f32 to vector<8x128xf32>
    %94 = arith.maximumf %92, %93 : vector<8x128xf32>
    %95 = arith.subf %94, %58 : vector<8x128xf32>
    %96 = arith.mulf %91, %95 : vector<8x128xf32>
    %97 = arith.addf %58, %96 : vector<8x128xf32>
    %98 = arith.addf %85, %97 : vector<8x128xf32>
    %99 = vector.extract_strided_slice %72 {offsets = [0, 512], sizes = [8, 128], strides = [1, 1]} : vector<8x768xf32> to vector<8x128xf32>
    %100 = arith.negf %99 : vector<8x128xf32>
    %101 = math.exp %100 : vector<8x128xf32>
    %cst_52 = arith.constant 1.000000e+00 : f32
    %102 = vector.broadcast %cst_52 : f32 to vector<8x128xf32>
    %103 = arith.addf %102, %101 : vector<8x128xf32>
    %104 = arith.divf %102, %103 : vector<8x128xf32>
    %105 = vector.extract_strided_slice %72 {offsets = [0, 640], sizes = [8, 128], strides = [1, 1]} : vector<8x768xf32> to vector<8x128xf32>
    %106 = arith.subf %105, %58 : vector<8x128xf32>
    %107 = arith.mulf %104, %106 : vector<8x128xf32>
    %108 = arith.addf %58, %107 : vector<8x128xf32>
    %109 = arith.addf %98, %108 : vector<8x128xf32>
    %c2_i32_53 = arith.constant 2 : i32
    %c2_i32_54 = arith.constant 2 : i32
    %c0_i32_55 = arith.constant 0 : i32
    %c1024_i32_56 = arith.constant 1024 : i32
    %110 = tpu.memref_slice %arg5[%c0_i32_55, %c1024_i32_56] : memref<128x2048xbf16, #tpu.memory_space<any>> -> memref<128x256xbf16, #tpu.memory_space<any>>
    %c0_i32_57 = arith.constant 0 : i32
    %c0_i32_58 = arith.constant 0 : i32
    %111 = tpu.memref_slice %arg7[%c2_i32_53, %c0_i32_57, %c0_i32_58] : memref<3x128x768xbf16, #tpu.memory_space<vmem>> -> memref<1x128x256xbf16, #tpu.memory_space<vmem>>
    %112 = tpu.memref_squeeze %111 : memref<1x128x256xbf16, #tpu.memory_space<vmem>> -> memref<128x256xbf16, #tpu.memory_space<vmem>>
    %113 = tpu.memref_slice %arg8[%c2_i32_54] : memref<3x!tpu.dma_semaphore, #tpu.memory_space<semaphore_mem>> -> memref<1x!tpu.dma_semaphore, #tpu.memory_space<semaphore_mem>>
    %114 = tpu.memref_squeeze %113 : memref<1x!tpu.dma_semaphore, #tpu.memory_space<semaphore_mem>> -> memref<!tpu.dma_semaphore, #tpu.memory_space<semaphore_mem>>
    tpu.wait_dma2 semaphore(%114 : memref<!tpu.dma_semaphore, #tpu.memory_space<semaphore_mem>>) src(%110 : memref<128x256xbf16, #tpu.memory_space<any>>) dst(%112 : memref<128x256xbf16, #tpu.memory_space<vmem>>)
    %c1_i32_59 = arith.constant 1 : i32
    %c1_i32_60 = arith.constant 1 : i32
    %c0_i32_61 = arith.constant 0 : i32
    %c1536_i32 = arith.constant 1536 : i32
    %115 = tpu.memref_slice %arg5[%c0_i32_61, %c1536_i32] : memref<128x2048xbf16, #tpu.memory_space<any>> -> memref<128x512xbf16, #tpu.memory_space<any>>
    %c0_i32_62 = arith.constant 0 : i32
    %c0_i32_63 = arith.constant 0 : i32
    %116 = tpu.memref_slice %arg7[%c1_i32_59, %c0_i32_62, %c0_i32_63] : memref<3x128x768xbf16, #tpu.memory_space<vmem>> -> memref<1x128x512xbf16, #tpu.memory_space<vmem>>
    %117 = tpu.memref_squeeze %116 : memref<1x128x512xbf16, #tpu.memory_space<vmem>> -> memref<128x512xbf16, #tpu.memory_space<vmem>>
    %118 = tpu.memref_slice %arg8[%c1_i32_60] : memref<3x!tpu.dma_semaphore, #tpu.memory_space<semaphore_mem>> -> memref<1x!tpu.dma_semaphore, #tpu.memory_space<semaphore_mem>>
    %119 = tpu.memref_squeeze %118 : memref<1x!tpu.dma_semaphore, #tpu.memory_space<semaphore_mem>> -> memref<!tpu.dma_semaphore, #tpu.memory_space<semaphore_mem>>
    tpu.enqueue_dma source(%115 : memref<128x512xbf16, #tpu.memory_space<any>>) target(%117 : memref<128x512xbf16, #tpu.memory_space<vmem>>) target_semaphore(%119 : memref<!tpu.dma_semaphore, #tpu.memory_space<semaphore_mem>>)
    %120 = arith.truncf %84 : vector<8x128xf32> to vector<8x128xbf16>
    %c2 = arith.constant 2 : index
    %c0_64 = arith.constant 0 : index
    %c0_65 = arith.constant 0 : index
    %121 = vector.load %arg7[%c2, %c0_64, %c0_65] : memref<3x128x768xbf16, #tpu.memory_space<vmem>>, vector<1x128x256xbf16>
    %122 = vector.shape_cast %121 : vector<1x128x256xbf16> to vector<128x256xbf16>
    %cst_66 = arith.constant dense<0.000000e+00> : vector<8x256xf32>
    %123 = tpu.matmul %120, %122, %cst_66 {dimension_numbers = #tpu.dot_dimension_numbers<[1], [0], [0], [1], [0, 0, 1, 1], [], []>} : vector<8x128xbf16>, vector<128x256xbf16>, vector<8x256xf32> -> vector<8x256xf32>
    %124 = vector.extract_strided_slice %123 {offsets = [0, 0], sizes = [8, 128], strides = [1, 1]} : vector<8x256xf32> to vector<8x128xf32>
    %125 = arith.negf %124 : vector<8x128xf32>
    %126 = math.exp %125 : vector<8x128xf32>
    %cst_67 = arith.constant 1.000000e+00 : f32
    %127 = vector.broadcast %cst_67 : f32 to vector<8x128xf32>
    %128 = arith.addf %127, %126 : vector<8x128xf32>
    %129 = arith.divf %127, %128 : vector<8x128xf32>
    %130 = vector.extract_strided_slice %123 {offsets = [0, 128], sizes = [8, 128], strides = [1, 1]} : vector<8x256xf32> to vector<8x128xf32>
    %131 = math.tanh %130 : vector<8x128xf32>
    %132 = arith.subf %131, %84 : vector<8x128xf32>
    %133 = arith.mulf %129, %132 : vector<8x128xf32>
    %134 = arith.addf %84, %133 : vector<8x128xf32>
    %135 = arith.addf %109, %134 : vector<8x128xf32>
    %c0_i32_68 = arith.constant 0 : i32
    %c0_i32_69 = arith.constant 0 : i32
    %c0_i32_70 = arith.constant 0 : i32
    %c1280_i32_71 = arith.constant 1280 : i32
    %136 = tpu.memref_slice %arg5[%c0_i32_70, %c1280_i32_71] : memref<128x2048xbf16, #tpu.memory_space<any>> -> memref<128x256xbf16, #tpu.memory_space<any>>
    %c0_i32_72 = arith.constant 0 : i32
    %c0_i32_73 = arith.constant 0 : i32
    %137 = tpu.memref_slice %arg7[%c0_i32_68, %c0_i32_72, %c0_i32_73] : memref<3x128x768xbf16, #tpu.memory_space<vmem>> -> memref<1x128x256xbf16, #tpu.memory_space<vmem>>
    %138 = tpu.memref_squeeze %137 : memref<1x128x256xbf16, #tpu.memory_space<vmem>> -> memref<128x256xbf16, #tpu.memory_space<vmem>>
    %139 = tpu.memref_slice %arg8[%c0_i32_69] : memref<3x!tpu.dma_semaphore, #tpu.memory_space<semaphore_mem>> -> memref<1x!tpu.dma_semaphore, #tpu.memory_space<semaphore_mem>>
    %140 = tpu.memref_squeeze %139 : memref<1x!tpu.dma_semaphore, #tpu.memory_space<semaphore_mem>> -> memref<!tpu.dma_semaphore, #tpu.memory_space<semaphore_mem>>
    tpu.wait_dma2 semaphore(%140 : memref<!tpu.dma_semaphore, #tpu.memory_space<semaphore_mem>>) src(%136 : memref<128x256xbf16, #tpu.memory_space<any>>) dst(%138 : memref<128x256xbf16, #tpu.memory_space<vmem>>)
    %141 = arith.truncf %97 : vector<8x128xf32> to vector<8x128xbf16>
    %c0_74 = arith.constant 0 : index
    %c0_75 = arith.constant 0 : index
    %c0_76 = arith.constant 0 : index
    %142 = vector.load %arg7[%c0_74, %c0_75, %c0_76] : memref<3x128x768xbf16, #tpu.memory_space<vmem>>, vector<1x128x256xbf16>
    %143 = vector.shape_cast %142 : vector<1x128x256xbf16> to vector<128x256xbf16>
    %cst_77 = arith.constant dense<0.000000e+00> : vector<8x256xf32>
    %144 = tpu.matmul %141, %143, %cst_77 {dimension_numbers = #tpu.dot_dimension_numbers<[1], [0], [0], [1], [0, 0, 1, 1], [], []>} : vector<8x128xbf16>, vector<128x256xbf16>, vector<8x256xf32> -> vector<8x256xf32>
    %145 = vector.extract_strided_slice %144 {offsets = [0, 0], sizes = [8, 128], strides = [1, 1]} : vector<8x256xf32> to vector<8x128xf32>
    %146 = arith.negf %145 : vector<8x128xf32>
    %147 = math.exp %146 : vector<8x128xf32>
    %cst_78 = arith.constant 1.000000e+00 : f32
    %148 = vector.broadcast %cst_78 : f32 to vector<8x128xf32>
    %149 = arith.addf %148, %147 : vector<8x128xf32>
    %150 = arith.divf %148, %149 : vector<8x128xf32>
    %151 = vector.extract_strided_slice %144 {offsets = [0, 128], sizes = [8, 128], strides = [1, 1]} : vector<8x256xf32> to vector<8x128xf32>
    %152 = math.tanh %151 : vector<8x128xf32>
    %153 = arith.subf %152, %97 : vector<8x128xf32>
    %154 = arith.mulf %150, %153 : vector<8x128xf32>
    %155 = arith.addf %97, %154 : vector<8x128xf32>
    %156 = arith.addf %135, %155 : vector<8x128xf32>
    %c1_i32_79 = arith.constant 1 : i32
    %c1_i32_80 = arith.constant 1 : i32
    %c0_i32_81 = arith.constant 0 : i32
    %c1536_i32_82 = arith.constant 1536 : i32
    %157 = tpu.memref_slice %arg5[%c0_i32_81, %c1536_i32_82] : memref<128x2048xbf16, #tpu.memory_space<any>> -> memref<128x512xbf16, #tpu.memory_space<any>>
    %c0_i32_83 = arith.constant 0 : i32
    %c0_i32_84 = arith.constant 0 : i32
    %158 = tpu.memref_slice %arg7[%c1_i32_79, %c0_i32_83, %c0_i32_84] : memref<3x128x768xbf16, #tpu.memory_space<vmem>> -> memref<1x128x512xbf16, #tpu.memory_space<vmem>>
    %159 = tpu.memref_squeeze %158 : memref<1x128x512xbf16, #tpu.memory_space<vmem>> -> memref<128x512xbf16, #tpu.memory_space<vmem>>
    %160 = tpu.memref_slice %arg8[%c1_i32_80] : memref<3x!tpu.dma_semaphore, #tpu.memory_space<semaphore_mem>> -> memref<1x!tpu.dma_semaphore, #tpu.memory_space<semaphore_mem>>
    %161 = tpu.memref_squeeze %160 : memref<1x!tpu.dma_semaphore, #tpu.memory_space<semaphore_mem>> -> memref<!tpu.dma_semaphore, #tpu.memory_space<semaphore_mem>>
    tpu.wait_dma2 semaphore(%161 : memref<!tpu.dma_semaphore, #tpu.memory_space<semaphore_mem>>) src(%157 : memref<128x512xbf16, #tpu.memory_space<any>>) dst(%159 : memref<128x512xbf16, #tpu.memory_space<vmem>>)
    %162 = arith.truncf %134 : vector<8x128xf32> to vector<8x128xbf16>
    %c1_85 = arith.constant 1 : index
    %c0_86 = arith.constant 0 : index
    %c0_87 = arith.constant 0 : index
    %163 = vector.load %arg7[%c1_85, %c0_86, %c0_87] : memref<3x128x768xbf16, #tpu.memory_space<vmem>>, vector<1x128x512xbf16>
    %164 = vector.shape_cast %163 : vector<1x128x512xbf16> to vector<128x512xbf16>
    %cst_88 = arith.constant dense<0.000000e+00> : vector<8x512xf32>
    %165 = tpu.matmul %162, %164, %cst_88 {dimension_numbers = #tpu.dot_dimension_numbers<[1], [0], [0], [1], [0, 0, 1, 1], [], []>} : vector<8x128xbf16>, vector<128x512xbf16>, vector<8x512xf32> -> vector<8x512xf32>
    %166 = vector.extract_strided_slice %165 {offsets = [0, 0], sizes = [8, 128], strides = [1, 1]} : vector<8x512xf32> to vector<8x128xf32>
    %167 = arith.negf %166 : vector<8x128xf32>
    %168 = math.exp %167 : vector<8x128xf32>
    %cst_89 = arith.constant 1.000000e+00 : f32
    %169 = vector.broadcast %cst_89 : f32 to vector<8x128xf32>
    %170 = arith.addf %169, %168 : vector<8x128xf32>
    %171 = arith.divf %169, %170 : vector<8x128xf32>
    %172 = vector.extract_strided_slice %165 {offsets = [0, 128], sizes = [8, 128], strides = [1, 1]} : vector<8x512xf32> to vector<8x128xf32>
    %173 = arith.negf %172 : vector<8x128xf32>
    %174 = math.exp %173 : vector<8x128xf32>
    %cst_90 = arith.constant 1.000000e+00 : f32
    %175 = vector.broadcast %cst_90 : f32 to vector<8x128xf32>
    %176 = arith.addf %175, %174 : vector<8x128xf32>
    %177 = arith.divf %175, %176 : vector<8x128xf32>
    %178 = arith.subf %177, %134 : vector<8x128xf32>
    %179 = arith.mulf %171, %178 : vector<8x128xf32>
    %180 = arith.addf %134, %179 : vector<8x128xf32>
    %181 = arith.addf %156, %180 : vector<8x128xf32>
    %182 = vector.extract_strided_slice %165 {offsets = [0, 256], sizes = [8, 128], strides = [1, 1]} : vector<8x512xf32> to vector<8x128xf32>
    %183 = arith.negf %182 : vector<8x128xf32>
    %184 = math.exp %183 : vector<8x128xf32>
    %cst_91 = arith.constant 1.000000e+00 : f32
    %185 = vector.broadcast %cst_91 : f32 to vector<8x128xf32>
    %186 = arith.addf %185, %184 : vector<8x128xf32>
    %187 = arith.divf %185, %186 : vector<8x128xf32>
    %188 = vector.extract_strided_slice %165 {offsets = [0, 384], sizes = [8, 128], strides = [1, 1]} : vector<8x512xf32> to vector<8x128xf32>
    %cst_92 = arith.constant 0.000000e+00 : f32
    %189 = vector.broadcast %cst_92 : f32 to vector<8x128xf32>
    %190 = arith.maximumf %188, %189 : vector<8x128xf32>
    %191 = arith.subf %190, %134 : vector<8x128xf32>
    %192 = arith.mulf %187, %191 : vector<8x128xf32>
    %193 = arith.addf %134, %192 : vector<8x128xf32>
    %194 = arith.addf %181, %193 : vector<8x128xf32>
    %cst_93 = arith.constant 1.250000e-01 : f32
    %195 = vector.broadcast %cst_93 : f32 to vector<8x128xf32>
    %196 = arith.mulf %194, %195 : vector<8x128xf32>
    %c0_94 = arith.constant 0 : index
    %c0_95 = arith.constant 0 : index
    %197 = vector.load %arg6[%c0_94, %c0_95] : memref<8x128xf32, #tpu.memory_space<vmem>>, vector<8x128xf32>
    tpu.vector_store %arg6[%c0_94, %c0_95], %196 {strides = array<i32>} : memref<8x128xf32, #tpu.memory_space<vmem>>, vector<8x128xf32>,
    return
  }
  func.func @transform_0(%arg0: i32) -> (i32, i32) {
    %c0_i32 = arith.constant 0 : i32
    %c0_i32_0 = arith.constant 0 : i32
    return %arg0, %c0_i32 : i32, i32
  }
  func.func @transform_1(%arg0: i32) -> (i32, i32) {
    %c0_i32 = arith.constant 0 : i32
    %c0_i32_0 = arith.constant 0 : i32
    return %arg0, %c0_i32 : i32, i32
  }
  func.func @transform_2(%arg0: i32) -> (i32, i32) {
    %c0_i32 = arith.constant 0 : i32
    %c0_i32_0 = arith.constant 0 : i32
    %c0_i32_1 = arith.constant 0 : i32
    return %c0_i32, %c0_i32_0 : i32, i32
  }
  func.func @transform_3(%arg0: i32) -> (i32, i32) {
    %c0_i32 = arith.constant 0 : i32
    %c0_i32_0 = arith.constant 0 : i32
    %c0_i32_1 = arith.constant 0 : i32
    return %c0_i32, %c0_i32_0 : i32, i32
  }
  func.func @transform_5(%arg0: i32) -> (i32, i32) {
    %c0_i32 = arith.constant 0 : i32
    %c0_i32_0 = arith.constant 0 : i32
    return %arg0, %c0_i32 : i32, i32
  }
}

</mosaic_0001>

<bundles_post_ra>
// kernel: tpu_custom_call.1
= control target key start
LH: loop header
LB: loop body
LE: loop exit
PB: predicated region body
PF: predicated region fallthrough
CT: control target
= control target key end

     0   :  { %10 = vsyncpa [#allocation5], 0  ;;  %s1657_s0 = inlined_call_operand.hbm [shape: f32[8,64], index: 0, kind: input, shape index: {}]   ;;  %s1658_s1 = inlined_call_operand.hbm [shape: f32[8,128], index: 1, kind: input, shape index: {}]   ;;  %s1659_s2 = inlined_call_operand.hbm [shape: bf16[64,256], index: 2, kind: input, shape index: {}]   ;;  %s1660_s3 = inlined_call_operand.hbm [shape: bf16[128,256], index: 3, kind: input, shape index: {}]   ;;  %s1661_s4 = inlined_call_operand.hbm [shape: bf16[128,2048], index: 4, kind: input, shape index: {}]   ;;  %s1662_s5 = inlined_call_operand.hbm [shape: f32[8,128], index: 5, kind: output, shape index: {}]  }
   0x1   :  { %11 = vsyncpa [#allocation8], 0 }
   0x2   :  { %12 = vsyncpa [#allocation11], 0 }
   0x3   :  { %13 = vsyncpa [#allocation6], 0  ;;  %s1397_s18 = smov [#allocation7]   ;;  %s1398_s20 = smov [#allocation4]  }
   0x4   :  { %s30_s19 = sshll.u32 %s1397_s18, 4  ;;  %s20_s21 = sshll.u32 %s1398_s20, 4  ;;  %s31_s19 = int_to_ptr.vmem [resolvable:$true] %s30_s19  ;;  %s21_s21 = int_to_ptr.vmem [resolvable:$true] %s20_s21 }
   0x5   :  { %s1269_s24 = scalar_lea.hbm %s1658_s1, 128 }
   0x6   :  { %p1270_p0 = scmp.ne.s32.totalorder %s1658_s1, %s1269_s24  ;;  %p1273_p1 = scmp.lt.u32.totalorder %s1269_s24, %s1658_s1 }
   0x8   :  { %p1275_p2 = pnand %p1273_p1, %p1270_p0 }
   0xa   :  { %1278 = shalt.err (!%p1275_p2)
}
   0xb   :  { %s1279_s29 = scalar_lea.vmem %s31_s19, 128  ;;  %p1284_p4 = scmp.lt.s32.totalorder %s31_s19, %s31_s19 }
   0xc   :  { %p1280_p3 = scmp.ne.s32.totalorder %s31_s19, %s1279_s29  ;;  %p1285_p5 = scmp.lt.s32.totalorder %s1279_s29, %s1279_s29 }
   0xe   :  { %p1286_p6 = por %p1285_p5, %p1284_p4 }
  0x10   :  { %p1287_p7 = pnand %p1286_p6, %p1280_p3 }
  0x12   :  { %1290 = shalt.err (!%p1287_p7)
}
  0x13   :  { %33 = dma.hbm_to_vmem [thread:$0]  %s1658_s1, 128, %s31_s19, [#allocation8]  }
  0x14   :  { %s1291_s9 = scalar_lea.hbm %s1657_s0, 128 }
  0x15   :  { %p1292_p8 = scmp.ne.s32.totalorder %s1657_s0, %s1291_s9  ;;  %p1295_p9 = scmp.lt.u32.totalorder %s1291_s9, %s1657_s0 }
  0x17   :  { %p1297_p10 = pnand %p1295_p9, %p1292_p8 }
  0x19   :  { %1300 = shalt.err (!%p1297_p10)
}
  0x1a   :  { %s1301_s14 = scalar_lea.vmem %s21_s21, 128  ;;  %p1306_p12 = scmp.lt.s32.totalorder %s21_s21, %s21_s21 }
  0x1b   :  { %p1302_p11 = scmp.ne.s32.totalorder %s21_s21, %s1301_s14  ;;  %p1307_p13 = scmp.lt.s32.totalorder %s1301_s14, %s1301_s14 }
  0x1d   :  { %p1308_p0 = por %p1307_p13, %p1306_p12 }
  0x1f   :  { %p1309_p1 = pnand %p1308_p0, %p1302_p11 }
  0x21   :  { %1312 = shalt.err (!%p1309_p1)
}
  0x22   :  { %23 = dma.hbm_to_vmem [thread:$0]  %s1657_s0, 128, %s21_s21, [#allocation5]  }
  0x23   :  { %s1399_s16 = smov [#allocation9]   ;;  %s1313_s20 = scalar_lea.hbm %s1659_s2, 1024 }
  0x24   :  { %s39_s17 = sshll.u32 %s1399_s16, 4  ;;  %p1314_p2 = scmp.ne.s32.totalorder %s1659_s2, %s1313_s20  ;;  %s40_s17 = int_to_ptr.vmem [resolvable:$true] %s39_s17 }
  0x25   :  { %p1317_p3 = scmp.lt.u32.totalorder %s1313_s20, %s1659_s2 }
  0x27   :  { %p1319_p4 = pnand %p1317_p3, %p1314_p2 }
  0x29   :  { %1322 = shalt.err (!%p1319_p4)
}
  0x2a   :  { %s1323_s26 = scalar_lea.vmem %s40_s17, 1024  ;;  %p1328_p6 = scmp.lt.s32.totalorder %s40_s17, %s40_s17 }
  0x2b   :  { %p1324_p5 = scmp.ne.s32.totalorder %s40_s17, %s1323_s26  ;;  %p1329_p7 = scmp.lt.s32.totalorder %s1323_s26, %s1323_s26 }
  0x2d   :  { %p1330_p8 = por %p1329_p7, %p1328_p6 }
  0x2f   :  { %p1331_p9 = pnand %p1330_p8, %p1324_p5 }
  0x31   :  { %1334 = shalt.err (!%p1331_p9)
}
  0x32   :  { %s1400_s0 = smov 128   ;;  %s1401_s21 = smov 8  }
  0x33   :  { %45 = dma.hbm_to_vmem [thread:$0]  %s1659_s2, 1024, %s40_s17, [#allocation8], %s1400_s0, %s1400_s0, %s1401_s21  }
  0x34   :  { %s1402_s29 = smov [#allocation10]   ;;  %s1335_s8 = scalar_lea.hbm %s1660_s3, 2048 }
  0x35   :  { %s51_s30 = sshll.u32 %s1402_s29, 4  ;;  %p1336_p10 = scmp.ne.s32.totalorder %s1660_s3, %s1335_s8  ;;  %s52_s30 = int_to_ptr.vmem [resolvable:$true] %s51_s30 }
  0x36   :  { %p1339_p11 = scmp.lt.u32.totalorder %s1335_s8, %s1660_s3 }
  0x38   :  { %p1341_p12 = pnand %p1339_p11, %p1336_p10 }
  0x3a   :  { %1344 = shalt.err (!%p1341_p12)
}
  0x3b   :  { %s1345_s13 = scalar_lea.vmem %s52_s30, 2048  ;;  %p1350_p0 = scmp.lt.s32.totalorder %s52_s30, %s52_s30 }
  0x3c   :  { %p1346_p13 = scmp.ne.s32.totalorder %s52_s30, %s1345_s13  ;;  %p1351_p1 = scmp.lt.s32.totalorder %s1345_s13, %s1345_s13 }
  0x3e   :  { %p1352_p2 = por %p1351_p1, %p1350_p0 }
  0x40   :  { %p1353_p3 = pnand %p1352_p2, %p1346_p13 }
  0x42   :  { %1356 = shalt.err (!%p1353_p3)
}
  0x43   :  { %57 = dma.hbm_to_vmem [thread:$0]  %s1660_s3, 2048, %s52_s30, [#allocation11], %s1400_s0, %s1400_s0, %s1401_s21  }
  0x44   :  { %1379 = dma.done.wait [#allocation5], 128  }
  0x45   :  { %1380 = vsyncadd [#allocation5], 4294967168 }
  0x46   :  { %1381 = dma.done.wait [#allocation8], 1152  }
  0x47   :  { %1382 = vsyncadd [#allocation8], 4294966144 }
  0x48   :  { %1383 = dma.done.wait [#allocation11], 2048  }
  0x49   :  { %1384 = vsyncadd [#allocation11], 4294965248  ;;  %s75_s1 = sld [smem:[#allocation0]]   ;;  %95 = sst [smem:[#allocation14 + $0x4]] %s1400_s0  ;;  %v1403_v0 = vmov 0   ;;  %vm332_vm0 = vcmask 523264  }
  0x4a   :  { %283 = vmatprep.mubr.bf16.mxu0 %v1403_v0  ;;  %s1404_s15 = smov [#allocation2]   ;;  %s1405_s17 = smov 2048  }
  0x4b   :  { %s1507_s16 = sshll.u32 %s1404_s15, 4  ;;  %87 = sst [smem:[#allocation14]] %s1405_s17  ;;  %s84_s16 = int_to_ptr.vmem [resolvable:$true] %s1507_s16 }
  0x4c   :  { %s1406_s3 = smov 768   ;;  %s1407_s18 = smov 2  }
  0x4d   :  { %89 = sst [smem:[#allocation14 + $0x1]] %s1406_s3  ;;  %s1408_s19 = smov 64  }
  0x4e   :  { %91 = sst [smem:[#allocation14 + $0x2]] %s1407_s18  ;;  %s1409_s23 = smov 1024  }
  0x4f   :  { %93 = sst [smem:[#allocation14 + $0x3]] %s1408_s19  ;;  %s1104_s20 = sshll.u32 %s75_s1, 26 }
  0x50   :  { %97 = sst [smem:[#allocation14 + $0x5]] %s1407_s18  ;;  %s1515_s22 = sadd.s32 134217728, %s1104_s20 }
  0x51   :  { %99 = sst [smem:[#allocation14 + $0x6]] %s1409_s23  ;;  %s1410_s24 = smov 4  }
  0x52   :  { %101 = sst [smem:[#allocation14 + $0x7]] %s1408_s19  ;;  %s1411_s25 = smov [#allocation3]  }
  0x53   :  { %103 = sst [smem:[#allocation14 + $0x8]] %s1410_s24  ;;  %s1412_s26 = smov [#allocation13]  }
  0x54   :  { %105 = dma.general %s1661_s4, 2048, %s84_s16, %s1411_s25, %s1412_s26, [#allocation14], %s1515_s22, 0  }
  0x55   :  { %124 = sst [smem:[#allocation16]] %s1405_s17  ;;  %s1413_s28 = smov 6  }
  0x56   :  { %126 = sst [smem:[#allocation16 + $0x1]] %s1406_s3  ;;  %s1414_s29 = smov [#allocation2 + $0x180]  }
  0x57   :  { %128 = sst [smem:[#allocation16 + $0x2]] %s1413_s28  ;;  %s1529_s30 = sshll.u32 %s1414_s29, 4  ;;  %s121_s30 = int_to_ptr.vmem [resolvable:$true] %s1529_s30 }
  0x58   :  { %130 = sst [smem:[#allocation16 + $0x3]] %s1408_s19  ;;  %s106_s8 = scalar_lea.hbm %s1661_s4, 128 }
  0x59   :  { %132 = sst [smem:[#allocation16 + $0x4]] %s1400_s0  ;;  %s1415_s9 = smov [#allocation3 + $0x1]  }
  0x5a   :  { %134 = sst [smem:[#allocation16 + $0x5]] %s1407_s18  ;;  %s1416_s10 = smov [#allocation15]  }
  0x5b   :  { %136 = sst [smem:[#allocation16 + $0x6]] %s1409_s23 }
  0x5c   :  { %138 = sst [smem:[#allocation16 + $0x7]] %s1408_s19 }
  0x5d   :  { %140 = sst [smem:[#allocation16 + $0x8]] %s1410_s24 }
  0x5e   :  { %142 = dma.general %s106_s8, 6144, %s121_s30, %s1415_s9, %s1416_s10, [#allocation16], %s1515_s22, 0  }
  0x5f   :  { %v1183_v1 = vld [vmem:[#allocation10 + $0x4] ss:$8 sps:$4 sm:$0xff]   ;;  %v1185_v2 = vld [vmem:[#allocation10] ss:$8 sps:$4 sm:$0xff]   ;;  %v1186_v3 = vld [vmem:[#allocation10 + $0x14] ss:$8 sps:$4 sm:$0xff]  }
  0x60   :  { %251 = vmatprep.subr.bf16.mxu0 %v1183_v1  ;;  %v1188_v4 = vld [vmem:[#allocation10 + $0x10] ss:$8 sps:$4 sm:$0xff]   ;;  %v1189_v5 = vld [vmem:[#allocation10 + $0x24] ss:$8 sps:$4 sm:$0xff]   ;;  %v1191_v6 = vld [vmem:[#allocation10 + $0x20] ss:$8 sps:$4 sm:$0xff]  }
  0x61   :  { %252 = vmatpush1.bf16.msra.mxu0 %v1185_v2  ;;  %v1192_v7 = vld [vmem:[#allocation10 + $0x34] ss:$8 sps:$4 sm:$0xff]   ;;  %v1194_v8 = vld [vmem:[#allocation10 + $0x30] ss:$8 sps:$4 sm:$0xff]   ;;  %v1195_v9 = vld [vmem:[#allocation10 + $0x44] ss:$8 sps:$4 sm:$0xff]  }
  0x62   :  { %253 = vmatprep.subr.bf16.mxu0 %v1186_v3  ;;  %v1197_v10 = vld [vmem:[#allocation10 + $0x40] ss:$8 sps:$4 sm:$0xff]   ;;  %v1198_v11 = vld [vmem:[#allocation10 + $0x54] ss:$8 sps:$4 sm:$0xff]   ;;  %v1200_v12 = vld [vmem:[#allocation10 + $0x50] ss:$8 sps:$4 sm:$0xff]  }
  0x63   :  { %v1201_v13 = vld [vmem:[#allocation10 + $0x64] ss:$8 sps:$4 sm:$0xff]   ;;  %v1203_v14 = vld [vmem:[#allocation10 + $0x60] ss:$8 sps:$4 sm:$0xff]   ;;  %v1204_v15 = vld [vmem:[#allocation10 + $0x74] ss:$8 sps:$4 sm:$0xff]  }
  0x64   :  { %v1206_v16 = vld [vmem:[#allocation10 + $0x70] ss:$8 sps:$4 sm:$0xff]   ;;  %v1209_v18 = vld [vmem:[#allocation9 + $0x4] ss:$8 sps:$4 sm:$0xff]   ;;  %v1207_v20 = vld [vmem:[#allocation9] ss:$8 sps:$4 sm:$0xff]  }
  0x65   :  { %254 = vmatpush1.bf16.msra.mxu0 %v1188_v4  ;;  %v145_v17 = vld [vmem:[#allocation7] sm:$0xff]  ;;  %v1215_v23 = vld [vmem:[#allocation9 + $0x24] ss:$8 sps:$4 sm:$0xff]   ;;  %v1213_v24 = vld [vmem:[#allocation9 + $0x20] ss:$8 sps:$4 sm:$0xff]  }
  0x66   :  { %255 = vmatprep.subr.bf16.mxu0 %v1189_v5  ;;  %v146_v19 = vpack.c.bf16 %v145_v17, %v145_v17  ;;  %v1212_v21 = vld [vmem:[#allocation9 + $0x14] ss:$8 sps:$4 sm:$0xff]   ;;  %v1210_v22 = vld [vmem:[#allocation9 + $0x10] ss:$8 sps:$4 sm:$0xff]  }
  0x67   :  { %v1218_v25 = vld [vmem:[#allocation9 + $0x34] ss:$8 sps:$4 sm:$0xff]   ;;  %v1216_v26 = vld [vmem:[#allocation9 + $0x30] ss:$8 sps:$4 sm:$0xff]  }
  0x68   :  { %v143_v27 = vld [vmem:[#allocation4] sm:$0xff] }
  0x69   :  { %256 = vmatpush1.bf16.msra.mxu0 %v1191_v6  ;;  %v144_v28 = vpack.c.bf16 %v143_v27, %v143_v27 }
  0x6a   :  { %257 = vmatprep.subr.bf16.mxu0 %v1192_v7 }
  0x6d   :  { %258 = vmatpush1.bf16.msra.mxu0 %v1194_v8 }
  0x6e   :  { %259 = vmatprep.subr.bf16.mxu0 %v1195_v9 }
  0x71   :  { %260 = vmatpush1.bf16.msra.mxu0 %v1197_v10 }
  0x72   :  { %261 = vmatprep.subr.bf16.mxu0 %v1198_v11 }
  0x75   :  { %262 = vmatpush1.bf16.msra.mxu0 %v1200_v12 }
  0x76   :  { %263 = vmatprep.subr.bf16.mxu0 %v1201_v13 }
  0x79   :  { %264 = vmatpush1.bf16.msra.mxu0 %v1203_v14 }
  0x7a   :  { %265 = vmatprep.subr.bf16.mxu0 %v1204_v15 }
  0x7d   :  { %266 = vmatpush1.bf16.msra.mxu0 %v1206_v16 }
  0x7e   :  { %336 = vmatprep.subr.bf16.mxu0 %v1209_v18 }
  0x80   :  { %284 = vmatmul.mubr.bf16.vlgmr.msra.gmra.mrb[0].mxu0 %v146_v19 }
  0x81   :  { %337 = vmatpush1.bf16.msra.mxu0 %v1207_v20  ;;  %368 = vmatprep.mubr.bf16.mxu0 %v1403_v0 }
  0x82   :  { %338 = vmatprep.subr.bf16.mxu0 %v1212_v21 }
  0x85   :  { %339 = vmatpush1.bf16.msra.mxu0 %v1210_v22 }
  0x86   :  { %340 = vmatprep.subr.bf16.mxu0 %v1215_v23 }
  0x89   :  { %341 = vmatpush1.bf16.msra.mxu0 %v1213_v24 }
  0x8a   :  { %342 = vmatprep.subr.bf16.mxu0 %v1218_v25 }
  0x8d   :  { %343 = vmatpush1.bf16.msra.mxu0 %v1216_v26 }
  0x90   :  { %1132 = vmatmul.mubr.msk.bf16.vlgmr.msra.gmra.mrb[0].mxu0 %vm332_vm0, %v144_v28 }
 0x163   :  { %v370_v29 = vpop.f32.mrb[0].mxu0 }
 0x164   :  { %v1133_v30 = vmul.f32 -1.442695, %v370_v29  ;;  %v372_v31 = vpop.f32.mrb[1].mxu0 }
 0x165   :  { %v374_v32 = vpop.f32.mrb[2].mxu0 }
 0x166   :  { %1219 = vpow2.f32 %v1133_v30  ;;  %v375_v33 = vpop.f32.mrb[3].mxu0 }
 0x167   :  { %1221 = vtanh.f32 %v372_v31 }
 0x170   :  { %v1220_v34 = vpop.eup %1219 }
 0x171   :  { %v380_v35 = vadd.f32 1.0, %v1220_v34  ;;  %v1222_v36 = vpop.eup %1221 }
 0x172   :  { %v384_v37 = vsub.f32 %v1222_v36, %v145_v17 }
 0x173   :  { %1223 = vrcp.f32 %v380_v35 }
 0x17d   :  { %v1224_v38 = vpop.eup %1223 }
 0x17e   :  { %v385_v39 = vmul.f32 %v1224_v38, %v384_v37 }
 0x180   :  { %v1546_v40 = vadd.f32 %v385_v39, %v145_v17 }
 0x181   :  { %1385 = dma.done.wait [#allocation3], 2048 }
 0x182   :  { %1386 = vsyncadd [#allocation3], 4294965248  ;;  %477 = vmatprep.mubr.bf16.mxu1 %v1403_v0  ;;  %409 = sst [smem:[#allocation18]] %s1405_s17  ;;  %s1417_s11 = smov [#allocation2 + $0x300]   ;;  %v428_v57 = vpack.c.bf16 %v1546_v40, %v1546_v40 }
 0x183   :  { %411 = sst [smem:[#allocation18 + $0x1]] %s1406_s3  ;;  %s405_s12 = sshll.u32 %s1417_s11, 4  ;;  %s406_s12 = int_to_ptr.vmem [resolvable:$true] %s405_s12 }
 0x184   :  { %413 = sst [smem:[#allocation18 + $0x2]] %s1407_s18  ;;  %s391_s14 = scalar_lea.hbm %s1661_s4, 512 }
 0x185   :  { %415 = sst [smem:[#allocation18 + $0x3]] %s1408_s19  ;;  %s1418_s1 = smov [#allocation3 + $0x2]  }
 0x186   :  { %417 = sst [smem:[#allocation18 + $0x4]] %s1400_s0  ;;  %s1419_s15 = smov [#allocation17]  }
 0x187   :  { %419 = sst [smem:[#allocation18 + $0x5]] %s1407_s18 }
 0x188   :  { %421 = sst [smem:[#allocation18 + $0x6]] %s1409_s23 }
 0x189   :  { %423 = sst [smem:[#allocation18 + $0x7]] %s1408_s19 }
 0x18a   :  { %425 = sst [smem:[#allocation18 + $0x8]] %s1410_s24 }
 0x18b   :  { %427 = dma.general %s391_s14, 2048, %s406_s12, %s1418_s1, %s1419_s15, [#allocation18], %s1515_s22, 0  }
 0x18c   :  { %v430_v41 = vld [vmem:[#allocation2 + $0x8] sm:$0xff]  ;;  %v429_v42 = vld [vmem:[#allocation2] sm:$0xff]  ;;  %v432_v43 = vld [vmem:[#allocation2 + $0x38] sm:$0xff] }
 0x18d   :  { %445 = vmatprep.subr.bf16.mxu1 %v430_v41  ;;  %v431_v44 = vld [vmem:[#allocation2 + $0x30] sm:$0xff]  ;;  %v434_v45 = vld [vmem:[#allocation2 + $0x68] sm:$0xff]  ;;  %v433_v46 = vld [vmem:[#allocation2 + $0x60] sm:$0xff] }
 0x18e   :  { %446 = vmatpush1.bf16.msra.mxu1 %v429_v42  ;;  %v436_v47 = vld [vmem:[#allocation2 + $0x98] sm:$0xff]  ;;  %v435_v48 = vld [vmem:[#allocation2 + $0x90] sm:$0xff]  ;;  %v438_v49 = vld [vmem:[#allocation2 + $0xc8] sm:$0xff] }
 0x18f   :  { %447 = vmatprep.subr.bf16.mxu1 %v432_v43  ;;  %v437_v50 = vld [vmem:[#allocation2 + $0xc0] sm:$0xff]  ;;  %v440_v51 = vld [vmem:[#allocation2 + $0xf8] sm:$0xff]  ;;  %v439_v52 = vld [vmem:[#allocation2 + $0xf0] sm:$0xff] }
 0x190   :  { %v442_v53 = vld [vmem:[#allocation2 + $0x128] sm:$0xff]  ;;  %v441_v54 = vld [vmem:[#allocation2 + $0x120] sm:$0xff]  ;;  %v444_v55 = vld [vmem:[#allocation2 + $0x158] sm:$0xff] }
 0x191   :  { %v443_v56 = vld [vmem:[#allocation2 + $0x150] sm:$0xff] }
 0x192   :  { %448 = vmatpush1.bf16.msra.mxu1 %v431_v44 }
 0x193   :  { %449 = vmatprep.subr.bf16.mxu1 %v434_v45 }
 0x196   :  { %450 = vmatpush1.bf16.msra.mxu1 %v433_v46 }
 0x197   :  { %451 = vmatprep.subr.bf16.mxu1 %v436_v47 }
 0x19a   :  { %452 = vmatpush1.bf16.msra.mxu1 %v435_v48 }
 0x19b   :  { %453 = vmatprep.subr.bf16.mxu1 %v438_v49 }
 0x19e   :  { %454 = vmatpush1.bf16.msra.mxu1 %v437_v50 }
 0x19f   :  { %455 = vmatprep.subr.bf16.mxu1 %v440_v51 }
 0x1a2   :  { %456 = vmatpush1.bf16.msra.mxu1 %v439_v52 }
 0x1a3   :  { %457 = vmatprep.subr.bf16.mxu1 %v442_v53 }
 0x1a6   :  { %458 = vmatpush1.bf16.msra.mxu1 %v441_v54 }
 0x1a7   :  { %459 = vmatprep.subr.bf16.mxu1 %v444_v55 }
 0x1aa   :  { %460 = vmatpush1.bf16.msra.mxu1 %v443_v56 }
 0x1ad   :  { %478 = vmatmul.mubr.bf16.vlgmr.msra.gmra.mrb[0].mxu1 %v428_v57 }
 0x280   :  { %v479_v58 = vpop.f32.mrb[0].mxu1 }
 0x281   :  { %v1136_v59 = vmul.f32 -1.442695, %v479_v58  ;;  %v481_v60 = vpop.f32.mrb[1].mxu1 }
 0x282   :  { %v1137_v61 = vmul.f32 -1.442695, %v481_v60  ;;  %v483_v62 = vpop.f32.mrb[2].mxu1 }
 0x283   :  { %1225 = vpow2.f32 %v1136_v59  ;;  %v484_v63 = vpop.f32.mrb[3].mxu1 }
 0x284   :  { %1227 = vpow2.f32 %v1137_v61 }
 0x28d   :  { %v1226_v1 = vpop.eup %1225 }
 0x28e   :  { %v1228_v2 = vpop.eup %1227  ;;  %v489_v3 = vadd.f32 1.0, %v1226_v1 }
 0x28f   :  { %v495_v4 = vadd.f32 1.0, %v1228_v2 }
 0x291   :  { %1229 = vrcp.f32 %v495_v4 }
 0x292   :  { %1231 = vrcp.f32 %v489_v3 }
 0x29b   :  { %v1230_v5 = vpop.eup %1229 }
 0x29c   :  { %v498_v6 = vsub.f32 %v1230_v5, %v1546_v40  ;;  %v1232_v7 = vpop.eup %1231 }
 0x29e   :  { %v499_v8 = vmul.f32 %v1232_v7, %v498_v6 }
 0x2a0   :  { %v1566_v9 = vadd.f32 %v499_v8, %v1546_v40 }
 0x2a1   :  { %1387 = dma.done.wait [#allocation3 + $0x1], 6144 }
 0x2a2   :  { %1388 = vsyncadd [#allocation3 + $0x1], 4294961152  ;;  %620 = vmatprep.mubr.bf16.mxu1 %v1403_v0  ;;  %661 = vmatprep.mubr.bf16.mxu0 %v1403_v0  ;;  %520 = sst [smem:[#allocation20]] %s1405_s17  ;;  %s504_s21 = scalar_lea.hbm %s1661_s4, 640  ;;  %v539_v43 = vpack.c.bf16 %v1566_v9, %v1566_v9 }
 0x2a3   :  { %522 = sst [smem:[#allocation20 + $0x1]] %s1406_s3  ;;  %s1420_s27 = smov [#allocation19]  }
 0x2a4   :  { %524 = sst [smem:[#allocation20 + $0x2]] %s1407_s18 }
 0x2a5   :  { %526 = sst [smem:[#allocation20 + $0x3]] %s1408_s19 }
 0x2a6   :  { %528 = sst [smem:[#allocation20 + $0x4]] %s1400_s0 }
 0x2a7   :  { %530 = sst [smem:[#allocation20 + $0x5]] %s1407_s18 }
 0x2a8   :  { %532 = sst [smem:[#allocation20 + $0x6]] %s1409_s23 }
 0x2a9   :  { %534 = sst [smem:[#allocation20 + $0x7]] %s1408_s19 }
 0x2aa   :  { %536 = sst [smem:[#allocation20 + $0x8]] %s1410_s24 }
 0x2ab   :  { %538 = dma.general %s504_s21, 2048, %s84_s16, %s1411_s25, %s1420_s27, [#allocation20], %s1515_s22, 0  }
 0x2ac   :  { %v541_v10 = vld [vmem:[#allocation2 + $0x188] sm:$0xff]  ;;  %v540_v11 = vld [vmem:[#allocation2 + $0x180] sm:$0xff]  ;;  %v543_v12 = vld [vmem:[#allocation2 + $0x198] sm:$0xff] }
 0x2ad   :  { %588 = vmatprep.subr.bf16.mxu1 %v541_v10  ;;  %629 = vmatprep.subr.bf16.mxu0 %v543_v12  ;;  %v542_v13 = vld [vmem:[#allocation2 + $0x190] sm:$0xff]  ;;  %v547_v14 = vld [vmem:[#allocation2 + $0x1b8] sm:$0xff]  ;;  %v549_v15 = vld [vmem:[#allocation2 + $0x1c8] sm:$0xff] }
 0x2ae   :  { %589 = vmatpush1.bf16.msra.mxu1 %v540_v11  ;;  %630 = vmatpush1.bf16.msra.mxu0 %v542_v13  ;;  %v546_v16 = vld [vmem:[#allocation2 + $0x1b0] sm:$0xff]  ;;  %v548_v17 = vld [vmem:[#allocation2 + $0x1c0] sm:$0xff]  ;;  %v553_v18 = vld [vmem:[#allocation2 + $0x1e8] sm:$0xff] }
 0x2af   :  { %590 = vmatprep.subr.bf16.mxu1 %v547_v14  ;;  %631 = vmatprep.subr.bf16.mxu0 %v549_v15  ;;  %v555_v19 = vld [vmem:[#allocation2 + $0x1f8] sm:$0xff]  ;;  %v552_v20 = vld [vmem:[#allocation2 + $0x1e0] sm:$0xff]  ;;  %v554_v21 = vld [vmem:[#allocation2 + $0x1f0] sm:$0xff] }
 0x2b0   :  { %v559_v22 = vld [vmem:[#allocation2 + $0x218] sm:$0xff]  ;;  %v561_v23 = vld [vmem:[#allocation2 + $0x228] sm:$0xff]  ;;  %v558_v24 = vld [vmem:[#allocation2 + $0x210] sm:$0xff] }
 0x2b1   :  { %v560_v25 = vld [vmem:[#allocation2 + $0x220] sm:$0xff]  ;;  %v565_v26 = vld [vmem:[#allocation2 + $0x248] sm:$0xff]  ;;  %v567_v27 = vld [vmem:[#allocation2 + $0x258] sm:$0xff] }
 0x2b2   :  { %591 = vmatpush1.bf16.msra.mxu1 %v546_v16  ;;  %632 = vmatpush1.bf16.msra.mxu0 %v548_v17  ;;  %v564_v28 = vld [vmem:[#allocation2 + $0x240] sm:$0xff]  ;;  %v566_v29 = vld [vmem:[#allocation2 + $0x250] sm:$0xff]  ;;  %v571_v30 = vld [vmem:[#allocation2 + $0x278] sm:$0xff] }
 0x2b3   :  { %592 = vmatprep.subr.bf16.mxu1 %v553_v18  ;;  %633 = vmatprep.subr.bf16.mxu0 %v555_v19  ;;  %v573_v31 = vld [vmem:[#allocation2 + $0x288] sm:$0xff]  ;;  %v570_v32 = vld [vmem:[#allocation2 + $0x270] sm:$0xff]  ;;  %v572_v33 = vld [vmem:[#allocation2 + $0x280] sm:$0xff] }
 0x2b4   :  { %v577_v34 = vld [vmem:[#allocation2 + $0x2a8] sm:$0xff]  ;;  %v579_v35 = vld [vmem:[#allocation2 + $0x2b8] sm:$0xff]  ;;  %v576_v36 = vld [vmem:[#allocation2 + $0x2a0] sm:$0xff] }
 0x2b5   :  { %v578_v37 = vld [vmem:[#allocation2 + $0x2b0] sm:$0xff]  ;;  %v583_v38 = vld [vmem:[#allocation2 + $0x2d8] sm:$0xff]  ;;  %v585_v39 = vld [vmem:[#allocation2 + $0x2e8] sm:$0xff] }
 0x2b6   :  { %593 = vmatpush1.bf16.msra.mxu1 %v552_v20  ;;  %634 = vmatpush1.bf16.msra.mxu0 %v554_v21  ;;  %v582_v40 = vld [vmem:[#allocation2 + $0x2d0] sm:$0xff]  ;;  %v584_v41 = vld [vmem:[#allocation2 + $0x2e0] sm:$0xff]  ;;  %v545_v42 = vld [vmem:[#allocation2 + $0x1a8] sm:$0xff] }
 0x2b7   :  { %594 = vmatprep.subr.bf16.mxu1 %v559_v22  ;;  %635 = vmatprep.subr.bf16.mxu0 %v561_v23  ;;  %v544_v44 = vld [vmem:[#allocation2 + $0x1a0] sm:$0xff]  ;;  %v551_v45 = vld [vmem:[#allocation2 + $0x1d8] sm:$0xff]  ;;  %v550_v46 = vld [vmem:[#allocation2 + $0x1d0] sm:$0xff] }
 0x2b8   :  { %v557_v47 = vld [vmem:[#allocation2 + $0x208] sm:$0xff]  ;;  %v556_v48 = vld [vmem:[#allocation2 + $0x200] sm:$0xff]  ;;  %v563_v49 = vld [vmem:[#allocation2 + $0x238] sm:$0xff] }
 0x2b9   :  { %v562_v50 = vld [vmem:[#allocation2 + $0x230] sm:$0xff]  ;;  %v569_v51 = vld [vmem:[#allocation2 + $0x268] sm:$0xff]  ;;  %v568_v52 = vld [vmem:[#allocation2 + $0x260] sm:$0xff] }
 0x2ba   :  { %595 = vmatpush1.bf16.msra.mxu1 %v558_v24  ;;  %636 = vmatpush1.bf16.msra.mxu0 %v560_v25  ;;  %v575_v53 = vld [vmem:[#allocation2 + $0x298] sm:$0xff]  ;;  %v574_v54 = vld [vmem:[#allocation2 + $0x290] sm:$0xff]  ;;  %v581_v55 = vld [vmem:[#allocation2 + $0x2c8] sm:$0xff] }
 0x2bb   :  { %596 = vmatprep.subr.bf16.mxu1 %v565_v26  ;;  %637 = vmatprep.subr.bf16.mxu0 %v567_v27  ;;  %v580_v56 = vld [vmem:[#allocation2 + $0x2c0] sm:$0xff]  ;;  %v587_v57 = vld [vmem:[#allocation2 + $0x2f8] sm:$0xff]  ;;  %v586_v58 = vld [vmem:[#allocation2 + $0x2f0] sm:$0xff] }
 0x2be   :  { %597 = vmatpush1.bf16.msra.mxu1 %v564_v28  ;;  %638 = vmatpush1.bf16.msra.mxu0 %v566_v29 }
 0x2bf   :  { %598 = vmatprep.subr.bf16.mxu1 %v571_v30  ;;  %639 = vmatprep.subr.bf16.mxu0 %v573_v31 }
 0x2c2   :  { %599 = vmatpush1.bf16.msra.mxu1 %v570_v32  ;;  %640 = vmatpush1.bf16.msra.mxu0 %v572_v33 }
 0x2c3   :  { %600 = vmatprep.subr.bf16.mxu1 %v577_v34  ;;  %641 = vmatprep.subr.bf16.mxu0 %v579_v35 }
 0x2c6   :  { %601 = vmatpush1.bf16.msra.mxu1 %v576_v36  ;;  %642 = vmatpush1.bf16.msra.mxu0 %v578_v37 }
 0x2c7   :  { %602 = vmatprep.subr.bf16.mxu1 %v583_v38  ;;  %643 = vmatprep.subr.bf16.mxu0 %v585_v39 }
 0x2ca   :  { %603 = vmatpush1.bf16.msra.mxu1 %v582_v40  ;;  %644 = vmatpush1.bf16.msra.mxu0 %v584_v41 }
 0x2cb   :  { %670 = vmatprep.subr.bf16.mxu1 %v545_v42 }
 0x2cd   :  { %621 = vmatmul.mubr.bf16.vlgmr.msra.gmra.mrb[4].mxu1 %v539_v43  ;;  %662 = vmatmul.mubr.bf16.vlgmr.msra.gmra.mrb[4].mxu0 %v539_v43 }
 0x2ce   :  { %671 = vmatpush1.bf16.msra.mxu1 %v544_v44  ;;  %702 = vmatprep.mubr.bf16.mxu1 %v1403_v0 }
 0x2cf   :  { %672 = vmatprep.subr.bf16.mxu1 %v551_v45 }
 0x2d2   :  { %673 = vmatpush1.bf16.msra.mxu1 %v550_v46 }
 0x2d3   :  { %674 = vmatprep.subr.bf16.mxu1 %v557_v47 }
 0x2d6   :  { %675 = vmatpush1.bf16.msra.mxu1 %v556_v48 }
 0x2d7   :  { %676 = vmatprep.subr.bf16.mxu1 %v563_v49 }
 0x2da   :  { %677 = vmatpush1.bf16.msra.mxu1 %v562_v50 }
 0x2db   :  { %678 = vmatprep.subr.bf16.mxu1 %v569_v51 }
 0x2de   :  { %679 = vmatpush1.bf16.msra.mxu1 %v568_v52 }
 0x2df   :  { %680 = vmatprep.subr.bf16.mxu1 %v575_v53 }
 0x2e2   :  { %681 = vmatpush1.bf16.msra.mxu1 %v574_v54 }
 0x2e3   :  { %682 = vmatprep.subr.bf16.mxu1 %v581_v55 }
 0x2e6   :  { %683 = vmatpush1.bf16.msra.mxu1 %v580_v56 }
 0x2e7   :  { %684 = vmatprep.subr.bf16.mxu1 %v587_v57 }
 0x2ea   :  { %685 = vmatpush1.bf16.msra.mxu1 %v586_v58 }
 0x2ed   :  { %703 = vmatmul.mubr.bf16.vlgmr.msra.gmra.mrb[8].mxu1 %v539_v43 }
 0x3a0   :  { %v622_v59 = vpop.f32.mrb[4].mxu1  ;;  %v663_v60 = vpop.f32.mrb[4].mxu0 }
 0x3a1   :  { %v1140_v61 = vmul.f32 -1.442695, %v622_v59  ;;  %v624_v62 = vpop.f32.mrb[5].mxu1  ;;  %v1141_v63 = vmul.f32 -1.442695, %v663_v60  ;;  %v665_v1 = vpop.f32.mrb[5].mxu0 }
 0x3a2   :  { %v626_v2 = vpop.f32.mrb[6].mxu1  ;;  %v667_v3 = vpop.f32.mrb[6].mxu0  ;;  %v728_v11 = vmax.f32 %v665_v1, 0.0  ;;  %v717_v12 = vmax.f32 %v624_v62, 0.0 }
 0x3a3   :  { %1233 = vpow2.f32 %v1140_v61  ;;  %v627_v4 = vpop.f32.mrb[7].mxu1  ;;  %v668_v5 = vpop.f32.mrb[7].mxu0 }
 0x3a4   :  { %1235 = vpow2.f32 %v1141_v63  ;;  %v729_v13 = vsub.f32 %v728_v11, %v1566_v9  ;;  %v718_v14 = vsub.f32 %v717_v12, %v1566_v9 }
 0x3ad   :  { %v1234_v6 = vpop.eup %1233 }
 0x3ae   :  { %v1236_v7 = vpop.eup %1235  ;;  %v714_v8 = vadd.f32 1.0, %v1234_v6 }
 0x3af   :  { %v725_v10 = vadd.f32 1.0, %v1236_v7 }
 0x3b0   :  { %1237 = vrcp.f32 %v714_v8 }
 0x3b1   :  { %1239 = vrcp.f32 %v725_v10 }
 0x3ba   :  { %v1238_v15 = vpop.eup %1237 }
 0x3bb   :  { %v1240_v16 = vpop.eup %1239  ;;  %v719_v17 = vmul.f32 %v1238_v15, %v718_v14 }
 0x3bc   :  { %v730_v18 = vmul.f32 %v1240_v16, %v729_v13 }
 0x3bd   :  { %v1592_v19 = vadd.f32 %v719_v17, %v1566_v9 }
 0x3be   :  { %v1595_v20 = vadd.f32 %v730_v18, %v1566_v9 }
 0x3bf   :  { %v721_v21 = vadd.f32 %v1592_v19, %v1566_v9 }
 0x3c0   :  { %v704_v22 = vpop.f32.mrb[8].mxu1 }
 0x3c1   :  { %v732_v23 = vadd.f32 %v1595_v20, %v721_v21  ;;  %v1142_v24 = vmul.f32 -1.442695, %v704_v22  ;;  %v706_v25 = vpop.f32.mrb[9].mxu1 }
 0x3c2   :  { %v708_v26 = vpop.f32.mrb[10].mxu1  ;;  %v739_v30 = vsub.f32 %v706_v25, %v1566_v9 }
 0x3c3   :  { %1241 = vpow2.f32 %v1142_v24  ;;  %v709_v27 = vpop.f32.mrb[11].mxu1 }
 0x3cd   :  { %v1242_v28 = vpop.eup %1241 }
 0x3ce   :  { %v736_v29 = vadd.f32 1.0, %v1242_v28 }
 0x3d0   :  { %1243 = vrcp.f32 %v736_v29 }
 0x3da   :  { %v1244_v31 = vpop.eup %1243 }
 0x3db   :  { %v740_v32 = vmul.f32 %v1244_v31, %v739_v30 }
 0x3dd   :  { %v741_v33 = vadd.f32 %v740_v32, %v1566_v9 }
 0x3df   :  { %v1602_v34 = vadd.f32 %v741_v33, %v732_v23 }
 0x3e0   :  { %1389 = dma.done.wait [#allocation3 + $0x2], 2048 }
 0x3e1   :  { %1390 = vsyncadd [#allocation3 + $0x2], 4294965248  ;;  %829 = vmatprep.mubr.bf16.mxu0 %v1403_v0  ;;  %761 = sst [smem:[#allocation22]] %s1405_s17  ;;  %s745_s28 = scalar_lea.hbm %s1661_s4, 768  ;;  %v780_v50 = vpack.c.bf16 %v1592_v19, %v1592_v19 }
 0x3e2   :  { %763 = sst [smem:[#allocation22 + $0x1]] %s1406_s3  ;;  %s1421_s17 = smov [#allocation21]  }
 0x3e3   :  { %765 = sst [smem:[#allocation22 + $0x2]] %s1410_s24 }
 0x3e4   :  { %767 = sst [smem:[#allocation22 + $0x3]] %s1408_s19 }
 0x3e5   :  { %769 = sst [smem:[#allocation22 + $0x4]] %s1400_s0 }
 0x3e6   :  { %771 = sst [smem:[#allocation22 + $0x5]] %s1407_s18 }
 0x3e7   :  { %773 = sst [smem:[#allocation22 + $0x6]] %s1409_s23 }
 0x3e8   :  { %775 = sst [smem:[#allocation22 + $0x7]] %s1408_s19 }
 0x3e9   :  { %777 = sst [smem:[#allocation22 + $0x8]] %s1410_s24 }
 0x3ea   :  { %779 = dma.general %s745_s28, 4096, %s121_s30, %s1415_s9, %s1421_s17, [#allocation22], %s1515_s22, 0  }
 0x3eb   :  { %v782_v9 = vld [vmem:[#allocation2 + $0x308] sm:$0xff]  ;;  %v781_v35 = vld [vmem:[#allocation2 + $0x300] sm:$0xff]  ;;  %v784_v36 = vld [vmem:[#allocation2 + $0x338] sm:$0xff] }
 0x3ec   :  { %797 = vmatprep.subr.bf16.mxu0 %v782_v9  ;;  %v783_v37 = vld [vmem:[#allocation2 + $0x330] sm:$0xff]  ;;  %v786_v38 = vld [vmem:[#allocation2 + $0x368] sm:$0xff]  ;;  %v785_v39 = vld [vmem:[#allocation2 + $0x360] sm:$0xff] }
 0x3ed   :  { %798 = vmatpush1.bf16.msra.mxu0 %v781_v35  ;;  %v788_v40 = vld [vmem:[#allocation2 + $0x398] sm:$0xff]  ;;  %v787_v41 = vld [vmem:[#allocation2 + $0x390] sm:$0xff]  ;;  %v790_v42 = vld [vmem:[#allocation2 + $0x3c8] sm:$0xff] }
 0x3ee   :  { %799 = vmatprep.subr.bf16.mxu0 %v784_v36  ;;  %v789_v43 = vld [vmem:[#allocation2 + $0x3c0] sm:$0xff]  ;;  %v792_v44 = vld [vmem:[#allocation2 + $0x3f8] sm:$0xff]  ;;  %v791_v45 = vld [vmem:[#allocation2 + $0x3f0] sm:$0xff] }
 0x3ef   :  { %v794_v46 = vld [vmem:[#allocation2 + $0x428] sm:$0xff]  ;;  %v793_v47 = vld [vmem:[#allocation2 + $0x420] sm:$0xff]  ;;  %v796_v48 = vld [vmem:[#allocation2 + $0x458] sm:$0xff] }
 0x3f0   :  { %v795_v49 = vld [vmem:[#allocation2 + $0x450] sm:$0xff] }
 0x3f1   :  { %800 = vmatpush1.bf16.msra.mxu0 %v783_v37 }
 0x3f2   :  { %801 = vmatprep.subr.bf16.mxu0 %v786_v38 }
 0x3f5   :  { %802 = vmatpush1.bf16.msra.mxu0 %v785_v39 }
 0x3f6   :  { %803 = vmatprep.subr.bf16.mxu0 %v788_v40 }
 0x3f9   :  { %804 = vmatpush1.bf16.msra.mxu0 %v787_v41 }
 0x3fa   :  { %805 = vmatprep.subr.bf16.mxu0 %v790_v42 }
 0x3fd   :  { %806 = vmatpush1.bf16.msra.mxu0 %v789_v43 }
 0x3fe   :  { %807 = vmatprep.subr.bf16.mxu0 %v792_v44 }
 0x401   :  { %808 = vmatpush1.bf16.msra.mxu0 %v791_v45 }
 0x402   :  { %809 = vmatprep.subr.bf16.mxu0 %v794_v46 }
 0x405   :  { %810 = vmatpush1.bf16.msra.mxu0 %v793_v47 }
 0x406   :  { %811 = vmatprep.subr.bf16.mxu0 %v796_v48 }
 0x409   :  { %812 = vmatpush1.bf16.msra.mxu0 %v795_v49 }
 0x40c   :  { %830 = vmatmul.mubr.bf16.vlgmr.msra.gmra.mrb[8].mxu0 %v780_v50 }
 0x4df   :  { %v831_v51 = vpop.f32.mrb[8].mxu0 }
 0x4e0   :  { %v1145_v52 = vmul.f32 -1.442695, %v831_v51  ;;  %v833_v53 = vpop.f32.mrb[9].mxu0 }
 0x4e1   :  { %v835_v54 = vpop.f32.mrb[10].mxu0 }
 0x4e2   :  { %1245 = vpow2.f32 %v1145_v52  ;;  %v836_v55 = vpop.f32.mrb[11].mxu0 }
 0x4e3   :  { %1247 = vtanh.f32 %v833_v53 }
 0x4ec   :  { %v1246_v56 = vpop.eup %1245 }
 0x4ed   :  { %v841_v57 = vadd.f32 1.0, %v1246_v56  ;;  %v1248_v58 = vpop.eup %1247 }
 0x4ee   :  { %v845_v59 = vsub.f32 %v1248_v58, %v1592_v19 }
 0x4ef   :  { %1249 = vrcp.f32 %v841_v57 }
 0x4f9   :  { %v1250_v60 = vpop.eup %1249 }
 0x4fa   :  { %v846_v61 = vmul.f32 %v1250_v60, %v845_v59 }
 0x4fc   :  { %v1625_v62 = vadd.f32 %v846_v61, %v1592_v19 }
 0x4fe   :  { %v848_v63 = vadd.f32 %v1625_v62, %v1602_v34 }
 0x4ff   :  { %1391 = dma.done.wait [#allocation3], 2048 }
 0x500   :  { %1392 = vsyncadd [#allocation3], 4294965248  ;;  %900 = vmatprep.mubr.bf16.mxu1 %v1403_v0  ;;  %v853_v1 = vld [vmem:[#allocation2 + $0x8] sm:$0xff]  ;;  %v852_v2 = vld [vmem:[#allocation2] sm:$0xff]  ;;  %v851_v18 = vpack.c.bf16 %v1595_v20, %v1595_v20 }
 0x501   :  { %v855_v3 = vld [vmem:[#allocation2 + $0x38] sm:$0xff]  ;;  %868 = vmatprep.subr.bf16.mxu1 %v853_v1  ;;  %v854_v4 = vld [vmem:[#allocation2 + $0x30] sm:$0xff]  ;;  %v857_v5 = vld [vmem:[#allocation2 + $0x68] sm:$0xff] }
 0x502   :  { %869 = vmatpush1.bf16.msra.mxu1 %v852_v2  ;;  %v856_v6 = vld [vmem:[#allocation2 + $0x60] sm:$0xff]  ;;  %v859_v7 = vld [vmem:[#allocation2 + $0x98] sm:$0xff]  ;;  %v858_v8 = vld [vmem:[#allocation2 + $0x90] sm:$0xff] }
 0x503   :  { %870 = vmatprep.subr.bf16.mxu1 %v855_v3  ;;  %v861_v10 = vld [vmem:[#allocation2 + $0xc8] sm:$0xff]  ;;  %v860_v11 = vld [vmem:[#allocation2 + $0xc0] sm:$0xff]  ;;  %v863_v12 = vld [vmem:[#allocation2 + $0xf8] sm:$0xff] }
 0x504   :  { %v862_v13 = vld [vmem:[#allocation2 + $0xf0] sm:$0xff]  ;;  %v865_v14 = vld [vmem:[#allocation2 + $0x128] sm:$0xff]  ;;  %v864_v15 = vld [vmem:[#allocation2 + $0x120] sm:$0xff] }
 0x505   :  { %v867_v16 = vld [vmem:[#allocation2 + $0x158] sm:$0xff]  ;;  %v866_v17 = vld [vmem:[#allocation2 + $0x150] sm:$0xff] }
 0x506   :  { %871 = vmatpush1.bf16.msra.mxu1 %v854_v4 }
 0x507   :  { %872 = vmatprep.subr.bf16.mxu1 %v857_v5 }
 0x50a   :  { %873 = vmatpush1.bf16.msra.mxu1 %v856_v6 }
 0x50b   :  { %874 = vmatprep.subr.bf16.mxu1 %v859_v7 }
 0x50e   :  { %875 = vmatpush1.bf16.msra.mxu1 %v858_v8 }
 0x50f   :  { %876 = vmatprep.subr.bf16.mxu1 %v861_v10 }
 0x512   :  { %877 = vmatpush1.bf16.msra.mxu1 %v860_v11 }
 0x513   :  { %878 = vmatprep.subr.bf16.mxu1 %v863_v12 }
 0x516   :  { %879 = vmatpush1.bf16.msra.mxu1 %v862_v13 }
 0x517   :  { %880 = vmatprep.subr.bf16.mxu1 %v865_v14 }
 0x51a   :  { %881 = vmatpush1.bf16.msra.mxu1 %v864_v15 }
 0x51b   :  { %882 = vmatprep.subr.bf16.mxu1 %v867_v16 }
 0x51e   :  { %883 = vmatpush1.bf16.msra.mxu1 %v866_v17 }
 0x521   :  { %901 = vmatmul.mubr.bf16.vlgmr.msra.gmra.mrb[12].mxu1 %v851_v18 }
 0x5f4   :  { %v902_v19 = vpop.f32.mrb[12].mxu1 }
 0x5f5   :  { %v1146_v21 = vmul.f32 -1.442695, %v902_v19  ;;  %v904_v22 = vpop.f32.mrb[13].mxu1 }
 0x5f6   :  { %v906_v23 = vpop.f32.mrb[14].mxu1 }
 0x5f7   :  { %1251 = vpow2.f32 %v1146_v21  ;;  %v907_v24 = vpop.f32.mrb[15].mxu1 }
 0x5f8   :  { %1253 = vtanh.f32 %v904_v22 }
 0x601   :  { %v1252_v25 = vpop.eup %1251 }
 0x602   :  { %v912_v26 = vadd.f32 1.0, %v1252_v25  ;;  %v1254_v27 = vpop.eup %1253 }
 0x603   :  { %v916_v28 = vsub.f32 %v1254_v27, %v1595_v20 }
 0x604   :  { %1255 = vrcp.f32 %v912_v26 }
 0x60e   :  { %v1256_v29 = vpop.eup %1255 }
 0x60f   :  { %v917_v30 = vmul.f32 %v1256_v29, %v916_v28 }
 0x611   :  { %v918_v31 = vadd.f32 %v917_v30, %v1595_v20 }
 0x613   :  { %v1634_v32 = vadd.f32 %v918_v31, %v848_v63 }
 0x614   :  { %1393 = dma.done.wait [#allocation3 + $0x1], 4096 }
 0x615   :  { %1394 = vsyncadd [#allocation3 + $0x1], 4294963200  ;;  %988 = vmatprep.mubr.bf16.mxu0 %v1403_v0  ;;  %1029 = vmatprep.mubr.bf16.mxu1 %v1403_v0  ;;  %v925_v33 = vld [vmem:[#allocation2 + $0x188] sm:$0xff]  ;;  %v927_v34 = vld [vmem:[#allocation2 + $0x198] sm:$0xff]  ;;  %v923_v63 = vpack.c.bf16 %v1625_v62, %v1625_v62  ;;  %s1422_s4 = smov [#allocation12]  }
 0x616   :  { %v924_v9 = vld [vmem:[#allocation2 + $0x180] sm:$0xff]  ;;  %956 = vmatprep.subr.bf16.mxu0 %v925_v33  ;;  %997 = vmatprep.subr.bf16.mxu1 %v927_v34  ;;  %v926_v35 = vld [vmem:[#allocation2 + $0x190] sm:$0xff]  ;;  %v929_v36 = vld [vmem:[#allocation2 + $0x1b8] sm:$0xff]  ;;  %s1073_s0 = sshll.u32 %s1422_s4, 4  ;;  %s1074_s0 = int_to_ptr.vmem [resolvable:$true] %s1073_s0 }
 0x617   :  { %v931_v37 = vld [vmem:[#allocation2 + $0x1c8] sm:$0xff]  ;;  %957 = vmatpush1.bf16.msra.mxu0 %v924_v9  ;;  %998 = vmatpush1.bf16.msra.mxu1 %v926_v35  ;;  %v928_v20 = vld [vmem:[#allocation2 + $0x1b0] sm:$0xff]  ;;  %v930_v38 = vld [vmem:[#allocation2 + $0x1c0] sm:$0xff]  ;;  %s1357_s3 = scalar_lea.vmem %s1074_s0, 128  ;;  %p1362_p5 = scmp.lt.s32.totalorder %s1074_s0, %s1074_s0 }
 0x618   :  { %958 = vmatprep.subr.bf16.mxu0 %v929_v36  ;;  %999 = vmatprep.subr.bf16.mxu1 %v931_v37  ;;  %v933_v39 = vld [vmem:[#allocation2 + $0x1e8] sm:$0xff]  ;;  %v935_v40 = vld [vmem:[#allocation2 + $0x1f8] sm:$0xff]  ;;  %v932_v0 = vld [vmem:[#allocation2 + $0x1e0] sm:$0xff]  ;;  %p1358_p4 = scmp.ne.s32.totalorder %s1074_s0, %s1357_s3  ;;  %p1363_p6 = scmp.lt.s32.totalorder %s1357_s3, %s1357_s3 }
 0x619   :  { %v934_v41 = vld [vmem:[#allocation2 + $0x1f0] sm:$0xff]  ;;  %v937_v42 = vld [vmem:[#allocation2 + $0x218] sm:$0xff]  ;;  %v939_v43 = vld [vmem:[#allocation2 + $0x228] sm:$0xff] }
 0x61a   :  { %v936_v44 = vld [vmem:[#allocation2 + $0x210] sm:$0xff]  ;;  %v938_v45 = vld [vmem:[#allocation2 + $0x220] sm:$0xff]  ;;  %v941_v46 = vld [vmem:[#allocation2 + $0x248] sm:$0xff]  ;;  %p1364_p7 = por %p1363_p6, %p1362_p5 }
 0x61b   :  { %959 = vmatpush1.bf16.msra.mxu0 %v928_v20  ;;  %1000 = vmatpush1.bf16.msra.mxu1 %v930_v38  ;;  %v943_v47 = vld [vmem:[#allocation2 + $0x258] sm:$0xff]  ;;  %v940_v48 = vld [vmem:[#allocation2 + $0x240] sm:$0xff]  ;;  %v942_v49 = vld [vmem:[#allocation2 + $0x250] sm:$0xff] }
 0x61c   :  { %960 = vmatprep.subr.bf16.mxu0 %v933_v39  ;;  %1001 = vmatprep.subr.bf16.mxu1 %v935_v40  ;;  %v945_v50 = vld [vmem:[#allocation2 + $0x278] sm:$0xff]  ;;  %v947_v51 = vld [vmem:[#allocation2 + $0x288] sm:$0xff]  ;;  %v944_v52 = vld [vmem:[#allocation2 + $0x270] sm:$0xff]  ;;  %p1365_p8 = pnand %p1364_p7, %p1358_p4 }
 0x61d   :  { %v946_v53 = vld [vmem:[#allocation2 + $0x280] sm:$0xff]  ;;  %v949_v54 = vld [vmem:[#allocation2 + $0x2a8] sm:$0xff]  ;;  %v951_v55 = vld [vmem:[#allocation2 + $0x2b8] sm:$0xff] }
 0x61e   :  { %v948_v56 = vld [vmem:[#allocation2 + $0x2a0] sm:$0xff]  ;;  %v950_v57 = vld [vmem:[#allocation2 + $0x2b0] sm:$0xff]  ;;  %v953_v58 = vld [vmem:[#allocation2 + $0x2d8] sm:$0xff] }
 0x61f   :  { %961 = vmatpush1.bf16.msra.mxu0 %v932_v0  ;;  %1002 = vmatpush1.bf16.msra.mxu1 %v934_v41  ;;  %v955_v59 = vld [vmem:[#allocation2 + $0x2e8] sm:$0xff]  ;;  %v952_v60 = vld [vmem:[#allocation2 + $0x2d0] sm:$0xff]  ;;  %v954_v61 = vld [vmem:[#allocation2 + $0x2e0] sm:$0xff] }
 0x620   :  { %962 = vmatprep.subr.bf16.mxu0 %v937_v42  ;;  %1003 = vmatprep.subr.bf16.mxu1 %v939_v43 }
 0x623   :  { %963 = vmatpush1.bf16.msra.mxu0 %v936_v44  ;;  %1004 = vmatpush1.bf16.msra.mxu1 %v938_v45 }
 0x624   :  { %964 = vmatprep.subr.bf16.mxu0 %v941_v46  ;;  %1005 = vmatprep.subr.bf16.mxu1 %v943_v47 }
 0x627   :  { %965 = vmatpush1.bf16.msra.mxu0 %v940_v48  ;;  %1006 = vmatpush1.bf16.msra.mxu1 %v942_v49 }
 0x628   :  { %966 = vmatprep.subr.bf16.mxu0 %v945_v50  ;;  %1007 = vmatprep.subr.bf16.mxu1 %v947_v51 }
 0x62b   :  { %967 = vmatpush1.bf16.msra.mxu0 %v944_v52  ;;  %1008 = vmatpush1.bf16.msra.mxu1 %v946_v53 }
 0x62c   :  { %968 = vmatprep.subr.bf16.mxu0 %v949_v54  ;;  %1009 = vmatprep.subr.bf16.mxu1 %v951_v55 }
 0x62f   :  { %969 = vmatpush1.bf16.msra.mxu0 %v948_v56  ;;  %1010 = vmatpush1.bf16.msra.mxu1 %v950_v57 }
 0x630   :  { %970 = vmatprep.subr.bf16.mxu0 %v953_v58  ;;  %1011 = vmatprep.subr.bf16.mxu1 %v955_v59 }
 0x633   :  { %971 = vmatpush1.bf16.msra.mxu0 %v952_v60  ;;  %1012 = vmatpush1.bf16.msra.mxu1 %v954_v61 }
 0x636   :  { %989 = vmatmul.mubr.bf16.vlgmr.msra.gmra.mrb[12].mxu0 %v923_v63  ;;  %1030 = vmatmul.mubr.bf16.vlgmr.msra.gmra.mrb[16].mxu1 %v923_v63 }
 0x709   :  { %v990_v1 = vpop.f32.mrb[12].mxu0  ;;  %v1031_v2 = vpop.f32.mrb[16].mxu1 }
 0x70a   :  { %v1147_v3 = vmul.f32 -1.442695, %v990_v1  ;;  %v1149_v4 = vmul.f32 -1.442695, %v1031_v2  ;;  %v992_v5 = vpop.f32.mrb[13].mxu0  ;;  %v1033_v6 = vpop.f32.mrb[17].mxu1 }
 0x70b   :  { %v1148_v7 = vmul.f32 -1.442695, %v992_v5  ;;  %v994_v8 = vpop.f32.mrb[14].mxu0  ;;  %v1035_v10 = vpop.f32.mrb[18].mxu1  ;;  %v1060_v19 = vmax.f32 %v1033_v6, 0.0 }
 0x70c   :  { %1257 = vpow2.f32 %v1147_v3  ;;  %v995_v11 = vpop.f32.mrb[15].mxu0  ;;  %v1036_v12 = vpop.f32.mrb[19].mxu1 }
 0x70d   :  { %1259 = vpow2.f32 %v1149_v4  ;;  %v1061_v21 = vsub.f32 %v1060_v19, %v1625_v62 }
 0x70e   :  { %1261 = vpow2.f32 %v1148_v7 }
 0x716   :  { %v1258_v13 = vpop.eup %1257 }
 0x717   :  { %v1260_v14 = vpop.eup %1259  ;;  %v1041_v17 = vadd.f32 1.0, %v1258_v13 }
 0x718   :  { %v1262_v15 = vpop.eup %1261  ;;  %v1057_v16 = vadd.f32 1.0, %v1260_v14 }
 0x719   :  { %v1047_v18 = vadd.f32 1.0, %v1262_v15 }
 0x71a   :  { %1263 = vrcp.f32 %v1057_v16 }
 0x71b   :  { %1265 = vrcp.f32 %v1047_v18 }
 0x71c   :  { %1267 = vrcp.f32 %v1041_v17 }
 0x724   :  { %v1264_v22 = vpop.eup %1263 }
 0x725   :  { %v1266_v23 = vpop.eup %1265  ;;  %v1062_v24 = vmul.f32 %v1264_v22, %v1061_v21 }
 0x726   :  { %v1050_v25 = vsub.f32 %v1266_v23, %v1625_v62  ;;  %v1268_v26 = vpop.eup %1267 }
 0x727   :  { %v1063_v29 = vadd.f32 %v1062_v24, %v1625_v62 }
 0x728   :  { %v1051_v27 = vmul.f32 %v1268_v26, %v1050_v25 }
 0x72a   :  { %v1052_v28 = vadd.f32 %v1051_v27, %v1625_v62 }
 0x72c   :  { %v1053_v30 = vadd.f32 %v1052_v28, %v1634_v32 }
 0x72e   :  { %v1064_v31 = vadd.f32 %v1063_v29, %v1053_v30 }
 0x730   :  { %v1065_v33 = vmul.f32 0.125, %v1064_v31 }
 0x732   :  { %1066 = vst [vmem:[#allocation12] sm:$0xff] %v1065_v33 }
 0x733   :  { %1368 = shalt.err (!%p1365_p8)
}
 0x734   :  { %s1369_s22 = scalar_lea.hbm %s1662_s5, 128 }
 0x735   :  { %p1370_p9 = scmp.ne.s32.totalorder %s1662_s5, %s1369_s22  ;;  %p1373_p10 = scmp.lt.u32.totalorder %s1369_s22, %s1662_s5 }
 0x737   :  { %p1375_p11 = pnand %p1373_p10, %p1370_p9 }
 0x739   :  { %1378 = shalt.err (!%p1375_p11)
}
 0x73a   :  { %1076 = dma.vmem_to_hbm [thread:$0]  %s1074_s0, 128, %s1662_s5, [#allocation6]  }
 0x73b   :  { %1395 = dma.done.wait [#allocation6], 128  }
 0x73c   :  { %1396 = vsyncadd [#allocation6], 4294967168 }
 0x73d   :  { %1080 = vsyncpa [#allocation5], 1 }
 0x73e   :  { %1081 = vsyncpa [#allocation8], 1 }
 0x73f   :  { %1082 = vsyncpa [#allocation11], 1 }
 0x740   :  { %1083 = vsyncpa [#allocation6], 1 }
 0x741   :  { %1084 = vsyncmov [#allocation3] }
 0x744   :  { %s1085_s8 = vpop.sfrf %1084 }
 0x745   :  { %p1150_p12 = scmp.ne.s32.totalorder %s1085_s8, 0 }
 0x747   :  { %1089 = shalt.err (%p1150_p12)  }
 0x748   :  { %1091 = vsyncmov [#allocation3 + $0x1] }
 0x74b   :  { %s1092_s9 = vpop.sfrf %1091 }
 0x74c   :  { %p1151_p13 = scmp.ne.s32.totalorder %s1092_s9, 0 }
 0x74e   :  { %1096 = shalt.err (%p1151_p13)  }
 0x74f   :  { %1098 = vsyncmov [#allocation3 + $0x2] }
 0x752   :  { %s1099_s10 = vpop.sfrf %1098 }
 0x753   :  { %p1152_p0 = scmp.ne.s32.totalorder %s1099_s10, 0 }
 0x755   :  { %1103 = shalt.err (%p1152_p0)  }

</bundles_post_ra>
